<compile_context>
chip_gen: v7x
topology: tpu7x:2x2x1
jax: 0.10.0
libtpu: 0.0.40
codegen_flags: <defaults>
</compile_context>

<pallas_src>
import functools
import math

import jax
import jax.numpy as jnp
from jax import lax
from jax.experimental import pallas as pl
from jax.experimental.pallas import tpu as pltpu


# ----------------------------------------------------------------------------
# Fused multi-layer encoder kernel. grid = (NB, L); l = program_id(1).
# The output block (same block for every layer step) holds the running activation.
# ----------------------------------------------------------------------------
def fused_encoder_kernel(
    src_ref, pos_ref,
    wqk_ref, bqk_ref, wv_ref, bv_ref, wo_ref, bo_ref,
    ln1w_ref, ln1b_ref,
    w1_ref, b1_ref, w2_ref, b2_ref,
    ln2w_ref, ln2b_ref,
    out_ref,
    ctx_ref,                       # VMEM scratch (M_blk, D) f32 — per-head context slab
    *, B_blk: int, S: int, nhead: int, head_dim: int,
    compute_dtype, eps: float = 1e-5,
):
    l = pl.program_id(1)           # layer index (inner, "arbitrary" axis)
    D = nhead * head_dim
    M = B_blk * S
    cdt = compute_dtype

    # Layer 0: seed the VMEM-resident activation with src (src is only read here).
    @pl.when(l == 0)
    def _():
        out_ref[...] = src_ref[...]

    x = out_ref[...]                       # (M, D) f32 running activation
    xp = x + pos_ref[...]                  # q = k = src + pos ; v = src

    # --- fused Q|K projection + V projection (bf16 operands, f32 accumulation).
    # 1/sqrt(head_dim) is already folded into the Q half of wqk/bqk.
    qk = jnp.dot(xp.astype(cdt), wqk_ref[0],
                 preferred_element_type=jnp.float32) + bqk_ref[0]   # (M, 2D) f32
    v = jnp.dot(x.astype(cdt), wv_ref[0],
                preferred_element_type=jnp.float32) + bv_ref[0]     # (M, D) f32

    q3 = qk[:, :D].reshape(B_blk, S, D).astype(cdt)
    k3 = qk[:, D:].reshape(B_blk, S, D).astype(cdt)
    v3 = v.reshape(B_blk, S, D).astype(cdt)

    # Per-head attention (B-batched 3-D einsums). Each head's context is stored
    # into ctx_ref at its lane offset; the out projection is one big matmul below.
    for h in range(nhead):                 # nhead is small; static unroll
        lo = h * head_dim
        hi = lo + head_dim
        s = jnp.einsum('bqd,bkd->bqk', q3[:, :, lo:hi], k3[:, :, lo:hi],
                       preferred_element_type=jnp.float32)          # (B, S, S) f32
        s = s - jnp.max(s, axis=-1, keepdims=True)
        e = jnp.exp(s)
        denom = jnp.sum(e, axis=-1, keepdims=True)                  # (B, S, 1)
        ctx = jnp.einsum('bqk,bkd->bqd', e.astype(cdt), v3[:, :, lo:hi],
                         preferred_element_type=jnp.float32)        # un-normalized
        ctx = ctx * pl.reciprocal(denom, approx=True)               # deferred softmax norm
        ctx_ref[:, lo:hi] = ctx.reshape(M, head_dim)

    # --- single K=D output projection over the assembled context slab ---------
    attn = jnp.dot(ctx_ref[...].astype(cdt), wo_ref[0],
                   preferred_element_type=jnp.float32) + bo_ref[0]  # (M, D) f32

    # --- residual + LayerNorm 1 (f32; dropout = identity in eval) -------------
    x1 = x + attn
    mu = jnp.mean(x1, axis=-1, keepdims=True)
    var = jnp.mean((x1 - mu) ** 2, axis=-1, keepdims=True)
    x1 = (x1 - mu) * lax.rsqrt(var + eps) * ln1w_ref[0] + ln1b_ref[0]

    # --- feed forward ----------------------------------------------------------
    h1 = jnp.dot(x1.astype(cdt), w1_ref[0],
                 preferred_element_type=jnp.float32) + b1_ref[0]
    h1 = jnp.maximum(h1, 0.0)                                       # ReLU
    h2 = jnp.dot(h1.astype(cdt), w2_ref[0],
                 preferred_element_type=jnp.float32) + b2_ref[0]

    # --- residual + LayerNorm 2 ------------------------------------------------
    x2 = x1 + h2
    mu2 = jnp.mean(x2, axis=-1, keepdims=True)
    var2 = jnp.mean((x2 - mu2) ** 2, axis=-1, keepdims=True)
    out_ref[...] = (x2 - mu2) * lax.rsqrt(var2 + eps) * ln2w_ref[0] + ln2b_ref[0]


def _vmem_limit_bytes(M_blk, D, Dff, B_blk, S, nhead):
    """Scoped-VMEM budget from the actual working set (clamped for portability)."""
    f32, bf16 = 4, 2
    act = 4 * M_blk * D * f32                                        # out + src + pos blocks
    weights = 2 * (2 * D * D + 2 * D * D + 2 * D * Dff) * bf16       # double-buffered layer weights
    inter = (2 * M_blk * D + 2 * M_blk * D + M_blk * Dff) * f32      # qk, v, x1/attn, h1
    scores = 3 * B_blk * S * S * f32                                 # one head's scores/exp live
    ctx = 2 * M_blk * D * f32                                        # ctx scratch + attn
    est = act + weights + inter + scores + ctx
    # Floor at the common default (32 MiB); cap at 64 MiB so the value is also
    # valid on v7x's smaller physical VMEM.
    return int(max(32 * 1024 * 1024, min(2 * est, 64 * 1024 * 1024)))


# ----------------------------------------------------------------------------
# Wrapper: one pallas_call for the whole encoder stack.
# ----------------------------------------------------------------------------
def transformer_encoder(src, pos, stacked, *, nhead, num_batch_blocks=2,
                        compute_dtype=jnp.bfloat16):
    """TransformerEncoder.forward. src/pos: [B, S, D]; stacked weights: [L, ...]."""
    B, S, D = src.shape
    L = stacked["wqk"].shape[0]
    Dff = stacked["w1"].shape[-1]
    head_dim = D // nhead

    # Leading "parallel" batch-split axis (whole sequences) so v7x's 2 TensorCores
    # each take a slice; fall back to a single block if shapes don't divide cleanly.
    NB = num_batch_blocks
    if NB < 1 or B % NB != 0 or ((B // NB) * S) % 8 != 0:
        NB = 1
    B_blk = B // NB
    M_blk = B_blk * S
    M = B * S

    src2 = src.reshape(M, D).astype(jnp.float32)
    pos2 = pos.reshape(M, D).astype(jnp.float32)

    def act_spec():
        return pl.BlockSpec((M_blk, D), lambda c, l: (c, 0))

    def per_layer(*shape):
        return pl.BlockSpec((1,) + shape, lambda c, l: (l,) + (0,) * len(shape))

    kernel = functools.partial(
        fused_encoder_kernel, B_blk=B_blk, S=S, nhead=nhead, head_dim=head_dim,
        compute_dtype=compute_dtype)

    out2 = pl.pallas_call(
        kernel,
        out_shape=jax.ShapeDtypeStruct((M, D), jnp.float32),
        grid_spec=pltpu.PrefetchScalarGridSpec(
            num_scalar_prefetch=0,
            grid=(NB, L),
            in_specs=[
                act_spec(),              # src (only read at l == 0)
                act_spec(),              # pos
                per_layer(D, 2 * D),     # wqk (wq*scale | wk), bf16
                per_layer(1, 2 * D),     # bqk (bq*scale | bk), f32
                per_layer(D, D),         # wv, bf16
                per_layer(1, D),         # bv
                per_layer(D, D),         # wo, bf16
                per_layer(1, D),         # bo
                per_layer(1, D),         # ln1 weight
                per_layer(1, D),         # ln1 bias
                per_layer(D, Dff),       # w1, bf16
                per_layer(1, Dff),       # b1
                per_layer(Dff, D),       # w2, bf16
                per_layer(1, D),         # b2
                per_layer(1, D),         # ln2 weight
                per_layer(1, D),         # ln2 bias
            ],
            out_specs=act_spec(),        # same block across layers -> VMEM resident
            scratch_shapes=[pltpu.VMEM((M_blk, D), jnp.float32)],   # per-head ctx slab
        ),
        compiler_params=pltpu.CompilerParams(
            dimension_semantics=("parallel", "arbitrary"),   # batch split || layers sequential
            vmem_limit_bytes=_vmem_limit_bytes(M_blk, D, Dff, B_blk, S, nhead),
        ),
    )(
        src2, pos2,
        stacked["wqk"], stacked["bqk"],
        stacked["wv"], stacked["bv"],
        stacked["wo"], stacked["bo"],
        stacked["ln1w"], stacked["ln1b"],
        stacked["w1"], stacked["b1"],
        stacked["w2"], stacked["b2"],
        stacked["ln2w"], stacked["ln2b"],
    )
    return out2.reshape(B, S, D)


# ----------------------------------------------------------------------------
# Parameter construction (mirrors the PyTorch module; weights stored [in, out]).
# ----------------------------------------------------------------------------
def init_layer_params(key, d_model, dim_feedforward):
    ks = jax.random.split(key, 8)
    s = 0.1

    def lin(k, fan_in, fan_out):
        kw, kb = jax.random.split(k)
        w = s * jax.random.normal(kw, (fan_in, fan_out), jnp.float32)
        b = s * jax.random.normal(kb, (1, fan_out), jnp.float32)
        return w, b

    wq, bq = lin(ks[0], d_model, d_model)
    wk, bk = lin(ks[1], d_model, d_model)
    wv, bv = lin(ks[2], d_model, d_model)
    wo, bo = lin(ks[3], d_model, d_model)
    w1, b1 = lin(ks[4], d_model, dim_feedforward)
    w2, b2 = lin(ks[5], dim_feedforward, d_model)
    ln1w = jnp.ones((1, d_model), jnp.float32)
    ln1b = jnp.zeros((1, d_model), jnp.float32)
    ln2w = jnp.ones((1, d_model), jnp.float32)
    ln2b = jnp.zeros((1, d_model), jnp.float32)
    return dict(wq=wq, bq=bq, wk=wk, bk=bk, wv=wv, bv=bv, wo=wo, bo=bo,
                ln1w=ln1w, ln1b=ln1b, w1=w1, b1=b1, w2=w2, b2=b2,
                ln2w=ln2w, ln2b=ln2b)


def stack_layer_params(layer_params, *, nhead, compute_dtype=jnp.bfloat16):
    """Stack per-layer params along a leading layer axis.

    Fuses wq|wk, folds 1/sqrt(head_dim) into the Q half, and pre-casts all
    matmul weights to the compute dtype once (no per-forward converts).
    """
    d_model = layer_params[0]["wq"].shape[0]
    head_dim = d_model // nhead
    scale = 1.0 / math.sqrt(head_dim)

    def stack(name, dtype=None):
        a = jnp.stack([p[name] for p in layer_params], axis=0)
        return a.astype(dtype) if dtype is not None else a

    wqk = jnp.stack(
        [jnp.concatenate([p["wq"] * scale, p["wk"]], axis=1) for p in layer_params],
        axis=0).astype(compute_dtype)
    bqk = jnp.stack(
        [jnp.concatenate([p["bq"] * scale, p["bk"]], axis=1) for p in layer_params],
        axis=0)
    return dict(wqk=wqk, bqk=bqk,
                wv=stack("wv", compute_dtype), bv=stack("bv"),
                wo=stack("wo", compute_dtype), bo=stack("bo"),
                ln1w=stack("ln1w"), ln1b=stack("ln1b"),
                w1=stack("w1", compute_dtype), b1=stack("b1"),
                w2=stack("w2", compute_dtype), b2=stack("b2"),
                ln2w=stack("ln2w"), ln2b=stack("ln2b"))


# ----------------------------------------------------------------------------
# Pure-JAX reference (same mixed-precision policy) for a sanity check.
# ----------------------------------------------------------------------------
def encoder_layer_reference(x, pos, prm, *, nhead, compute_dtype, eps=1e-5):
    B, S, D = x.shape
    dh = D // nhead
    cdt = compute_dtype
    xp = x + pos
    wqk = jnp.concatenate([prm["wq"], prm["wk"]], axis=1).astype(cdt)
    bqk = jnp.concatenate([prm["bq"], prm["bk"]], axis=1)
    qk = jnp.einsum('bsd,df->bsf', xp.astype(cdt), wqk,
                    preferred_element_type=jnp.float32) + bqk
    q = qk[..., :D] * (1.0 / math.sqrt(dh))
    k = qk[..., D:]
    v = jnp.einsum('bsd,df->bsf', x.astype(cdt), prm["wv"].astype(cdt),
                   preferred_element_type=jnp.float32) + prm["bv"]
    q4 = q.reshape(B, S, nhead, dh).astype(cdt)
    k4 = k.reshape(B, S, nhead, dh).astype(cdt)
    v4 = v.reshape(B, S, nhead, dh).astype(cdt)
    s = jnp.einsum('bqhd,bkhd->bhqk', q4, k4, preferred_element_type=jnp.float32)
    s = s - jnp.max(s, axis=-1, keepdims=True)
    e = jnp.exp(s)
    a = e / jnp.sum(e, axis=-1, keepdims=True)
    ctx = jnp.einsum('bhqk,bkhd->bqhd', a.astype(cdt), v4,
                     preferred_element_type=jnp.float32).reshape(B, S, D)
    attn = jnp.einsum('bsd,df->bsf', ctx.astype(cdt), prm["wo"].astype(cdt),
                      preferred_element_type=jnp.float32) + prm["bo"]
    x1 = x + attn
    mu = jnp.mean(x1, -1, keepdims=True)
    var = jnp.mean((x1 - mu) ** 2, -1, keepdims=True)
    x1 = (x1 - mu) * lax.rsqrt(var + eps) * prm["ln1w"] + prm["ln1b"]
    h1 = jnp.maximum(
        jnp.einsum('bsd,df->bsf', x1.astype(cdt), prm["w1"].astype(cdt),
                   preferred_element_type=jnp.float32) + prm["b1"], 0.0)
    h2 = jnp.einsum('bsf,fd->bsd', h1.astype(cdt), prm["w2"].astype(cdt),
                    preferred_element_type=jnp.float32) + prm["b2"]
    x2 = x1 + h2
    mu2 = jnp.mean(x2, -1, keepdims=True)
    var2 = jnp.mean((x2 - mu2) ** 2, -1, keepdims=True)
    return (x2 - mu2) * lax.rsqrt(var2 + eps) * prm["ln2w"] + prm["ln2b"]


def transformer_encoder_reference(src, pos, layer_params, *, nhead, compute_dtype):
    out = src
    for prm in layer_params:
        out = encoder_layer_reference(out, pos, prm, nhead=nhead,
                                      compute_dtype=compute_dtype)
    return out


if __name__ == "__main__":
    # Small shapes consistent with the module's forward(src, pos).
    # NOTE: D=32 keeps vregs lane-sparse; real models should use D >= 128.
    B, S, D = 2, 8, 32          # batch, sequence length, d_model
    NHEAD = 4
    DFF = 64                    # dim_feedforward
    NUM_LAYERS = 2
    COMPUTE_DTYPE = jnp.bfloat16   # matmul operand dtype (f32 accumulation / LN)

    key = jax.random.PRNGKey(0)
    k_src, k_pos, k_params = jax.random.split(key, 3)

    src = jax.random.normal(k_src, (B, S, D), jnp.float32)
    pos = jax.random.normal(k_pos, (B, S, D), jnp.float32)

    layer_keys = jax.random.split(k_params, NUM_LAYERS)
    # The PyTorch module deep-copies one encoder_layer, so all layers start from
    # identical weights; we mirror that by reusing layer_keys[0].
    layer_params = [init_layer_params(layer_keys[0], D, DFF)
                    for _ in range(NUM_LAYERS)]
    stacked = stack_layer_params(layer_params, nhead=NHEAD,
                                 compute_dtype=COMPUTE_DTYPE)

    out = transformer_encoder(src, pos, stacked, nhead=NHEAD,
                              num_batch_blocks=2, compute_dtype=COMPUTE_DTYPE)
    out = jax.block_until_ready(out)

    assert out.shape == (B, S, D) and out.dtype == jnp.float32
    assert bool(jnp.all(jnp.isfinite(out)))

    # Sanity check against a pure-JAX reference using the same precision policy
    # (loose tolerance covers approximate-reciprocal softmax, the folded Q scale
    # rounding in bf16, and MXU vs XLA accumulation-order differences).
    ref = transformer_encoder_reference(src, pos, layer_params, nhead=NHEAD,
                                        compute_dtype=COMPUTE_DTYPE)
    max_err = float(jnp.max(jnp.abs(out - ref)))
    assert max_err < 5e-2, f"kernel/reference mismatch, max abs err = {max_err}"

    print("KERNEL_OK")
</pallas_src>

<mosaic_0001>
module attributes {stable_mosaic.version = 11 : i64} {
  func.func @fused_encoder_kernel(%arg0: i32, %arg1: i32, %arg2: memref<8x32xf32, #tpu.memory_space<vmem>>, %arg3: memref<8x32xf32, #tpu.memory_space<vmem>>, %arg4: memref<1x32x64xbf16, #tpu.memory_space<vmem>>, %arg5: memref<1x1x64xf32, #tpu.memory_space<vmem>>, %arg6: memref<1x32x32xbf16, #tpu.memory_space<vmem>>, %arg7: memref<1x1x32xf32, #tpu.memory_space<vmem>>, %arg8: memref<1x32x32xbf16, #tpu.memory_space<vmem>>, %arg9: memref<1x1x32xf32, #tpu.memory_space<vmem>>, %arg10: memref<1x1x32xf32, #tpu.memory_space<vmem>>, %arg11: memref<1x1x32xf32, #tpu.memory_space<vmem>>, %arg12: memref<1x32x64xbf16, #tpu.memory_space<vmem>>, %arg13: memref<1x1x64xf32, #tpu.memory_space<vmem>>, %arg14: memref<1x64x32xbf16, #tpu.memory_space<vmem>>, %arg15: memref<1x1x32xf32, #tpu.memory_space<vmem>>, %arg16: memref<1x1x32xf32, #tpu.memory_space<vmem>>, %arg17: memref<1x1x32xf32, #tpu.memory_space<vmem>>, %arg18: memref<8x32xf32, #tpu.memory_space<vmem>>, %arg19: memref<8x32xf32, #tpu.memory_space<vmem>>) attributes {dimension_semantics = [#tpu.dimension_semantics<parallel>, #tpu.dimension_semantics<arbitrary>], iteration_bounds = array<i64: 2, 2>, scalar_prefetch = 0 : i64, scratch_operands = 1 : i64, tpu.core_type = #tpu.core_type<tc>, window_params = [{transform_indices = @transform_0, window_bounds = array<i64: 8, 32>}, {transform_indices = @transform_1, window_bounds = array<i64: 8, 32>}, {transform_indices = @transform_2, window_bounds = array<i64: 1, 32, 64>}, {transform_indices = @transform_3, window_bounds = array<i64: 1, 1, 64>}, {transform_indices = @transform_4, window_bounds = array<i64: 1, 32, 32>}, {transform_indices = @transform_5, window_bounds = array<i64: 1, 1, 32>}, {transform_indices = @transform_6, window_bounds = array<i64: 1, 32, 32>}, {transform_indices = @transform_7, window_bounds = array<i64: 1, 1, 32>}, {transform_indices = @transform_8, window_bounds = array<i64: 1, 1, 32>}, {transform_indices = @transform_9, window_bounds = array<i64: 1, 1, 32>}, {transform_indices = @transform_10, window_bounds = array<i64: 1, 32, 64>}, {transform_indices = @transform_11, window_bounds = array<i64: 1, 1, 64>}, {transform_indices = @transform_12, window_bounds = array<i64: 1, 64, 32>}, {transform_indices = @transform_13, window_bounds = array<i64: 1, 1, 32>}, {transform_indices = @transform_14, window_bounds = array<i64: 1, 1, 32>}, {transform_indices = @transform_15, window_bounds = array<i64: 1, 1, 32>}, {transform_indices = @transform_16, window_bounds = array<i64: 8, 32>}]} {
    %c0_i32 = arith.constant 0 : i32
    %0 = arith.cmpi eq, %arg1, %c0_i32 : i32
    %1 = arith.extui %0 : i1 to i32
    %c0_i32_0 = arith.constant 0 : i32
    %2 = arith.cmpi ne, %1, %c0_i32_0 : i32
    scf.if %2 {
      %c0_86 = arith.constant 0 : index
      %c0_87 = arith.constant 0 : index
      %184 = vector.load %arg2[%c0_86, %c0_87] : memref<8x32xf32, #tpu.memory_space<vmem>>, vector<8x32xf32>
      %c0_88 = arith.constant 0 : index
      %c0_89 = arith.constant 0 : index
      %185 = vector.load %arg18[%c0_88, %c0_89] : memref<8x32xf32, #tpu.memory_space<vmem>>, vector<8x32xf32>
      tpu.vector_store %arg18[%c0_88, %c0_89], %184 {strides = array<i32>} : memref<8x32xf32, #tpu.memory_space<vmem>>, vector<8x32xf32>,
    } else {
    }
    %c0 = arith.constant 0 : index
    %c0_1 = arith.constant 0 : index
    %3 = vector.load %arg18[%c0, %c0_1] : memref<8x32xf32, #tpu.memory_space<vmem>>, vector<8x32xf32>
    %c0_2 = arith.constant 0 : index
    %c0_3 = arith.constant 0 : index
    %4 = vector.load %arg3[%c0_2, %c0_3] : memref<8x32xf32, #tpu.memory_space<vmem>>, vector<8x32xf32>
    %5 = arith.addf %3, %4 : vector<8x32xf32>
    %6 = arith.truncf %5 : vector<8x32xf32> to vector<8x32xbf16>
    %c0_4 = arith.constant 0 : index
    %c0_5 = arith.constant 0 : index
    %c0_6 = arith.constant 0 : index
    %7 = vector.load %arg4[%c0_4, %c0_5, %c0_6] : memref<1x32x64xbf16, #tpu.memory_space<vmem>>, vector<1x32x64xbf16>
    %8 = vector.shape_cast %7 : vector<1x32x64xbf16> to vector<32x64xbf16>
    %cst = arith.constant dense<0.000000e+00> : vector<8x64xf32>
    %9 = tpu.matmul %6, %8, %cst {dimension_numbers = #tpu.dot_dimension_numbers<[1], [0], [0], [1], [0, 0, 1, 1], [], []>} : vector<8x32xbf16>, vector<32x64xbf16>, vector<8x64xf32> -> vector<8x64xf32>
    %c0_7 = arith.constant 0 : index
    %c0_8 = arith.constant 0 : index
    %c0_9 = arith.constant 0 : index
    %10 = vector.load %arg5[%c0_7, %c0_8, %c0_9] : memref<1x1x64xf32, #tpu.memory_space<vmem>>, vector<1x1x64xf32>
    %11 = vector.shape_cast %10 : vector<1x1x64xf32> to vector<1x64xf32>
    %12 = vector.broadcast %11 : vector<1x64xf32> to vector<8x64xf32>
    %13 = arith.addf %9, %12 : vector<8x64xf32>
    %14 = arith.truncf %3 : vector<8x32xf32> to vector<8x32xbf16>
    %c0_10 = arith.constant 0 : index
    %c0_11 = arith.constant 0 : index
    %c0_12 = arith.constant 0 : index
    %15 = vector.load %arg6[%c0_10, %c0_11, %c0_12] : memref<1x32x32xbf16, #tpu.memory_space<vmem>>, vector<1x32x32xbf16>
    %16 = vector.shape_cast %15 : vector<1x32x32xbf16> to vector<32x32xbf16>
    %cst_13 = arith.constant dense<0.000000e+00> : vector<8x32xf32>
    %17 = tpu.matmul %14, %16, %cst_13 {dimension_numbers = #tpu.dot_dimension_numbers<[1], [0], [0], [1], [0, 0, 1, 1], [], []>} : vector<8x32xbf16>, vector<32x32xbf16>, vector<8x32xf32> -> vector<8x32xf32>
    %c0_14 = arith.constant 0 : index
    %c0_15 = arith.constant 0 : index
    %c0_16 = arith.constant 0 : index
    %18 = vector.load %arg7[%c0_14, %c0_15, %c0_16] : memref<1x1x32xf32, #tpu.memory_space<vmem>>, vector<1x1x32xf32>
    %19 = vector.shape_cast %18 : vector<1x1x32xf32> to vector<1x32xf32>
    %20 = vector.broadcast %19 : vector<1x32xf32> to vector<8x32xf32>
    %21 = arith.addf %17, %20 : vector<8x32xf32>
    %22 = vector.extract_strided_slice %13 {offsets = [0, 0], sizes = [8, 32], strides = [1, 1]} : vector<8x64xf32> to vector<8x32xf32>
    %23 = vector.shape_cast %22 : vector<8x32xf32> to vector<1x8x32xf32>
    %24 = arith.truncf %23 : vector<1x8x32xf32> to vector<1x8x32xbf16>
    %25 = vector.extract_strided_slice %13 {offsets = [0, 32], sizes = [8, 32], strides = [1, 1]} : vector<8x64xf32> to vector<8x32xf32>
    %26 = vector.shape_cast %25 : vector<8x32xf32> to vector<1x8x32xf32>
    %27 = arith.truncf %26 : vector<1x8x32xf32> to vector<1x8x32xbf16>
    %28 = vector.shape_cast %21 : vector<8x32xf32> to vector<1x8x32xf32>
    %29 = arith.truncf %28 : vector<1x8x32xf32> to vector<1x8x32xbf16>
    %30 = vector.extract_strided_slice %24 {offsets = [0, 0, 0], sizes = [1, 8, 8], strides = [1, 1, 1]} : vector<1x8x32xbf16> to vector<1x8x8xbf16>
    %31 = vector.extract_strided_slice %27 {offsets = [0, 0, 0], sizes = [1, 8, 8], strides = [1, 1, 1]} : vector<1x8x32xbf16> to vector<1x8x8xbf16>
    "tpu.trace_start"() <{level = 10 : i32, message = "bqd,bkd->bqk"}> : () -> ()
    %cst_17 = arith.constant dense<0.000000e+00> : vector<1x8x8xf32>
    %32 = tpu.matmul %30, %31, %cst_17 {dimension_numbers = #tpu.dot_dimension_numbers<[2], [2], [1], [1], [0, 0, 0, 1, 1, 1], [0], [0]>} : vector<1x8x8xbf16>, vector<1x8x8xbf16>, vector<1x8x8xf32> -> vector<1x8x8xf32>
    "tpu.trace_stop"() : () -> ()
    %cst_18 = arith.constant dense<0xFF800000> : vector<1x8xf32>
    %33 = vector.multi_reduction <maximumf>, %32, %cst_18 [2] : vector<1x8x8xf32> to vector<1x8xf32>
    %34 = vector.shape_cast %33 : vector<1x8xf32> to vector<1x8x1xf32>
    %35 = vector.broadcast %34 : vector<1x8x1xf32> to vector<1x8x8xf32>
    %36 = arith.subf %32, %35 : vector<1x8x8xf32>
    %37 = math.exp %36 : vector<1x8x8xf32>
    %cst_19 = arith.constant dense<0.000000e+00> : vector<1x8xf32>
    %38 = vector.multi_reduction <add>, %37, %cst_19 [2] : vector<1x8x8xf32> to vector<1x8xf32>
    %39 = vector.shape_cast %38 : vector<1x8xf32> to vector<1x8x1xf32>
    %40 = arith.truncf %37 : vector<1x8x8xf32> to vector<1x8x8xbf16>
    %41 = vector.extract_strided_slice %29 {offsets = [0, 0, 0], sizes = [1, 8, 8], strides = [1, 1, 1]} : vector<1x8x32xbf16> to vector<1x8x8xbf16>
    "tpu.trace_start"() <{level = 10 : i32, message = "bqk,bkd->bqd"}> : () -> ()
    %cst_20 = arith.constant dense<0.000000e+00> : vector<1x8x8xf32>
    %42 = tpu.matmul %40, %41, %cst_20 {dimension_numbers = #tpu.dot_dimension_numbers<[2], [1], [1], [2], [0, 0, 0, 1, 1, 2], [0], [0]>} : vector<1x8x8xbf16>, vector<1x8x8xbf16>, vector<1x8x8xf32> -> vector<1x8x8xf32>
    "tpu.trace_stop"() : () -> ()
    %43 = tpu.reciprocal %39 {approx = true} : vector<1x8x1xf32> -> vector<1x8x1xf32>
    %44 = vector.broadcast %43 : vector<1x8x1xf32> to vector<1x8x8xf32>
    %45 = arith.mulf %42, %44 : vector<1x8x8xf32>
    %46 = vector.shape_cast %45 : vector<1x8x8xf32> to vector<8x8xf32>
    %c0_21 = arith.constant 0 : index
    %c0_22 = arith.constant 0 : index
    %47 = vector.load %arg19[%c0_21, %c0_22] : memref<8x32xf32, #tpu.memory_space<vmem>>, vector<8x8xf32>
    tpu.vector_store %arg19[%c0_21, %c0_22], %46 {strides = array<i32>} : memref<8x32xf32, #tpu.memory_space<vmem>>, vector<8x8xf32>,
    %48 = vector.extract_strided_slice %24 {offsets = [0, 0, 8], sizes = [1, 8, 8], strides = [1, 1, 1]} : vector<1x8x32xbf16> to vector<1x8x8xbf16>
    %49 = vector.extract_strided_slice %27 {offsets = [0, 0, 8], sizes = [1, 8, 8], strides = [1, 1, 1]} : vector<1x8x32xbf16> to vector<1x8x8xbf16>
    "tpu.trace_start"() <{level = 10 : i32, message = "bqd,bkd->bqk"}> : () -> ()
    %cst_23 = arith.constant dense<0.000000e+00> : vector<1x8x8xf32>
    %50 = tpu.matmul %48, %49, %cst_23 {dimension_numbers = #tpu.dot_dimension_numbers<[2], [2], [1], [1], [0, 0, 0, 1, 1, 1], [0], [0]>} : vector<1x8x8xbf16>, vector<1x8x8xbf16>, vector<1x8x8xf32> -> vector<1x8x8xf32>
    "tpu.trace_stop"() : () -> ()
    %cst_24 = arith.constant dense<0xFF800000> : vector<1x8xf32>
    %51 = vector.multi_reduction <maximumf>, %50, %cst_24 [2] : vector<1x8x8xf32> to vector<1x8xf32>
    %52 = vector.shape_cast %51 : vector<1x8xf32> to vector<1x8x1xf32>
    %53 = vector.broadcast %52 : vector<1x8x1xf32> to vector<1x8x8xf32>
    %54 = arith.subf %50, %53 : vector<1x8x8xf32>
    %55 = math.exp %54 : vector<1x8x8xf32>
    %cst_25 = arith.constant dense<0.000000e+00> : vector<1x8xf32>
    %56 = vector.multi_reduction <add>, %55, %cst_25 [2] : vector<1x8x8xf32> to vector<1x8xf32>
    %57 = vector.shape_cast %56 : vector<1x8xf32> to vector<1x8x1xf32>
    %58 = arith.truncf %55 : vector<1x8x8xf32> to vector<1x8x8xbf16>
    %59 = vector.extract_strided_slice %29 {offsets = [0, 0, 8], sizes = [1, 8, 8], strides = [1, 1, 1]} : vector<1x8x32xbf16> to vector<1x8x8xbf16>
    "tpu.trace_start"() <{level = 10 : i32, message = "bqk,bkd->bqd"}> : () -> ()
    %cst_26 = arith.constant dense<0.000000e+00> : vector<1x8x8xf32>
    %60 = tpu.matmul %58, %59, %cst_26 {dimension_numbers = #tpu.dot_dimension_numbers<[2], [1], [1], [2], [0, 0, 0, 1, 1, 2], [0], [0]>} : vector<1x8x8xbf16>, vector<1x8x8xbf16>, vector<1x8x8xf32> -> vector<1x8x8xf32>
    "tpu.trace_stop"() : () -> ()
    %61 = tpu.reciprocal %57 {approx = true} : vector<1x8x1xf32> -> vector<1x8x1xf32>
    %62 = vector.broadcast %61 : vector<1x8x1xf32> to vector<1x8x8xf32>
    %63 = arith.mulf %60, %62 : vector<1x8x8xf32>
    %64 = vector.shape_cast %63 : vector<1x8x8xf32> to vector<8x8xf32>
    %c0_27 = arith.constant 0 : index
    %c8 = arith.constant 8 : index
    %65 = vector.load %arg19[%c0_27, %c8] : memref<8x32xf32, #tpu.memory_space<vmem>>, vector<8x8xf32>
    tpu.vector_store %arg19[%c0_27, %c8], %64 {strides = array<i32>} : memref<8x32xf32, #tpu.memory_space<vmem>>, vector<8x8xf32>,
    %66 = vector.extract_strided_slice %24 {offsets = [0, 0, 16], sizes = [1, 8, 8], strides = [1, 1, 1]} : vector<1x8x32xbf16> to vector<1x8x8xbf16>
    %67 = vector.extract_strided_slice %27 {offsets = [0, 0, 16], sizes = [1, 8, 8], strides = [1, 1, 1]} : vector<1x8x32xbf16> to vector<1x8x8xbf16>
    "tpu.trace_start"() <{level = 10 : i32, message = "bqd,bkd->bqk"}> : () -> ()
    %cst_28 = arith.constant dense<0.000000e+00> : vector<1x8x8xf32>
    %68 = tpu.matmul %66, %67, %cst_28 {dimension_numbers = #tpu.dot_dimension_numbers<[2], [2], [1], [1], [0, 0, 0, 1, 1, 1], [0], [0]>} : vector<1x8x8xbf16>, vector<1x8x8xbf16>, vector<1x8x8xf32> -> vector<1x8x8xf32>
    "tpu.trace_stop"() : () -> ()
    %cst_29 = arith.constant dense<0xFF800000> : vector<1x8xf32>
    %69 = vector.multi_reduction <maximumf>, %68, %cst_29 [2] : vector<1x8x8xf32> to vector<1x8xf32>
    %70 = vector.shape_cast %69 : vector<1x8xf32> to vector<1x8x1xf32>
    %71 = vector.broadcast %70 : vector<1x8x1xf32> to vector<1x8x8xf32>
    %72 = arith.subf %68, %71 : vector<1x8x8xf32>
    %73 = math.exp %72 : vector<1x8x8xf32>
    %cst_30 = arith.constant dense<0.000000e+00> : vector<1x8xf32>
    %74 = vector.multi_reduction <add>, %73, %cst_30 [2] : vector<1x8x8xf32> to vector<1x8xf32>
    %75 = vector.shape_cast %74 : vector<1x8xf32> to vector<1x8x1xf32>
    %76 = arith.truncf %73 : vector<1x8x8xf32> to vector<1x8x8xbf16>
    %77 = vector.extract_strided_slice %29 {offsets = [0, 0, 16], sizes = [1, 8, 8], strides = [1, 1, 1]} : vector<1x8x32xbf16> to vector<1x8x8xbf16>
    "tpu.trace_start"() <{level = 10 : i32, message = "bqk,bkd->bqd"}> : () -> ()
    %cst_31 = arith.constant dense<0.000000e+00> : vector<1x8x8xf32>
    %78 = tpu.matmul %76, %77, %cst_31 {dimension_numbers = #tpu.dot_dimension_numbers<[2], [1], [1], [2], [0, 0, 0, 1, 1, 2], [0], [0]>} : vector<1x8x8xbf16>, vector<1x8x8xbf16>, vector<1x8x8xf32> -> vector<1x8x8xf32>
    "tpu.trace_stop"() : () -> ()
    %79 = tpu.reciprocal %75 {approx = true} : vector<1x8x1xf32> -> vector<1x8x1xf32>
    %80 = vector.broadcast %79 : vector<1x8x1xf32> to vector<1x8x8xf32>
    %81 = arith.mulf %78, %80 : vector<1x8x8xf32>
    %82 = vector.shape_cast %81 : vector<1x8x8xf32> to vector<8x8xf32>
    %c0_32 = arith.constant 0 : index
    %c16 = arith.constant 16 : index
    %83 = vector.load %arg19[%c0_32, %c16] : memref<8x32xf32, #tpu.memory_space<vmem>>, vector<8x8xf32>
    tpu.vector_store %arg19[%c0_32, %c16], %82 {strides = array<i32>} : memref<8x32xf32, #tpu.memory_space<vmem>>, vector<8x8xf32>,
    %84 = vector.extract_strided_slice %24 {offsets = [0, 0, 24], sizes = [1, 8, 8], strides = [1, 1, 1]} : vector<1x8x32xbf16> to vector<1x8x8xbf16>
    %85 = vector.extract_strided_slice %27 {offsets = [0, 0, 24], sizes = [1, 8, 8], strides = [1, 1, 1]} : vector<1x8x32xbf16> to vector<1x8x8xbf16>
    "tpu.trace_start"() <{level = 10 : i32, message = "bqd,bkd->bqk"}> : () -> ()
    %cst_33 = arith.constant dense<0.000000e+00> : vector<1x8x8xf32>
    %86 = tpu.matmul %84, %85, %cst_33 {dimension_numbers = #tpu.dot_dimension_numbers<[2], [2], [1], [1], [0, 0, 0, 1, 1, 1], [0], [0]>} : vector<1x8x8xbf16>, vector<1x8x8xbf16>, vector<1x8x8xf32> -> vector<1x8x8xf32>
    "tpu.trace_stop"() : () -> ()
    %cst_34 = arith.constant dense<0xFF800000> : vector<1x8xf32>
    %87 = vector.multi_reduction <maximumf>, %86, %cst_34 [2] : vector<1x8x8xf32> to vector<1x8xf32>
    %88 = vector.shape_cast %87 : vector<1x8xf32> to vector<1x8x1xf32>
    %89 = vector.broadcast %88 : vector<1x8x1xf32> to vector<1x8x8xf32>
    %90 = arith.subf %86, %89 : vector<1x8x8xf32>
    %91 = math.exp %90 : vector<1x8x8xf32>
    %cst_35 = arith.constant dense<0.000000e+00> : vector<1x8xf32>
    %92 = vector.multi_reduction <add>, %91, %cst_35 [2] : vector<1x8x8xf32> to vector<1x8xf32>
    %93 = vector.shape_cast %92 : vector<1x8xf32> to vector<1x8x1xf32>
    %94 = arith.truncf %91 : vector<1x8x8xf32> to vector<1x8x8xbf16>
    %95 = vector.extract_strided_slice %29 {offsets = [0, 0, 24], sizes = [1, 8, 8], strides = [1, 1, 1]} : vector<1x8x32xbf16> to vector<1x8x8xbf16>
    "tpu.trace_start"() <{level = 10 : i32, message = "bqk,bkd->bqd"}> : () -> ()
    %cst_36 = arith.constant dense<0.000000e+00> : vector<1x8x8xf32>
    %96 = tpu.matmul %94, %95, %cst_36 {dimension_numbers = #tpu.dot_dimension_numbers<[2], [1], [1], [2], [0, 0, 0, 1, 1, 2], [0], [0]>} : vector<1x8x8xbf16>, vector<1x8x8xbf16>, vector<1x8x8xf32> -> vector<1x8x8xf32>
    "tpu.trace_stop"() : () -> ()
    %97 = tpu.reciprocal %93 {approx = true} : vector<1x8x1xf32> -> vector<1x8x1xf32>
    %98 = vector.broadcast %97 : vector<1x8x1xf32> to vector<1x8x8xf32>
    %99 = arith.mulf %96, %98 : vector<1x8x8xf32>
    %100 = vector.shape_cast %99 : vector<1x8x8xf32> to vector<8x8xf32>
    %c0_37 = arith.constant 0 : index
    %c24 = arith.constant 24 : index
    %101 = vector.load %arg19[%c0_37, %c24] : memref<8x32xf32, #tpu.memory_space<vmem>>, vector<8x8xf32>
    tpu.vector_store %arg19[%c0_37, %c24], %100 {strides = array<i32>} : memref<8x32xf32, #tpu.memory_space<vmem>>, vector<8x8xf32>,
    %c0_38 = arith.constant 0 : index
    %c0_39 = arith.constant 0 : index
    %102 = vector.load %arg19[%c0_38, %c0_39] : memref<8x32xf32, #tpu.memory_space<vmem>>, vector<8x32xf32>
    %103 = arith.truncf %102 : vector<8x32xf32> to vector<8x32xbf16>
    %c0_40 = arith.constant 0 : index
    %c0_41 = arith.constant 0 : index
    %c0_42 = arith.constant 0 : index
    %104 = vector.load %arg8[%c0_40, %c0_41, %c0_42] : memref<1x32x32xbf16, #tpu.memory_space<vmem>>, vector<1x32x32xbf16>
    %105 = vector.shape_cast %104 : vector<1x32x32xbf16> to vector<32x32xbf16>
    %cst_43 = arith.constant dense<0.000000e+00> : vector<8x32xf32>
    %106 = tpu.matmul %103, %105, %cst_43 {dimension_numbers = #tpu.dot_dimension_numbers<[1], [0], [0], [1], [0, 0, 1, 1], [], []>} : vector<8x32xbf16>, vector<32x32xbf16>, vector<8x32xf32> -> vector<8x32xf32>
    %c0_44 = arith.constant 0 : index
    %c0_45 = arith.constant 0 : index
    %c0_46 = arith.constant 0 : index
    %107 = vector.load %arg9[%c0_44, %c0_45, %c0_46] : memref<1x1x32xf32, #tpu.memory_space<vmem>>, vector<1x1x32xf32>
    %108 = vector.shape_cast %107 : vector<1x1x32xf32> to vector<1x32xf32>
    %109 = vector.broadcast %108 : vector<1x32xf32> to vector<8x32xf32>
    %110 = arith.addf %106, %109 : vector<8x32xf32>
    %111 = arith.addf %3, %110 : vector<8x32xf32>
    %cst_47 = arith.constant dense<0.000000e+00> : vector<8xf32>
    %112 = vector.multi_reduction <add>, %111, %cst_47 [1] : vector<8x32xf32> to vector<8xf32>
    %113 = vector.shape_cast %112 : vector<8xf32> to vector<8x1xf32>
    %cst_48 = arith.constant 3.200000e+01 : f32
    %114 = vector.broadcast %cst_48 : f32 to vector<8x1xf32>
    %115 = arith.divf %113, %114 : vector<8x1xf32>
    %116 = vector.broadcast %115 : vector<8x1xf32> to vector<8x32xf32>
    %117 = arith.subf %111, %116 : vector<8x32xf32>
    %118 = arith.mulf %117, %117 : vector<8x32xf32>
    %cst_49 = arith.constant dense<0.000000e+00> : vector<8xf32>
    %119 = vector.multi_reduction <add>, %118, %cst_49 [1] : vector<8x32xf32> to vector<8xf32>
    %120 = vector.shape_cast %119 : vector<8xf32> to vector<8x1xf32>
    %cst_50 = arith.constant 3.200000e+01 : f32
    %121 = vector.broadcast %cst_50 : f32 to vector<8x1xf32>
    %122 = arith.divf %120, %121 : vector<8x1xf32>
    %123 = vector.broadcast %115 : vector<8x1xf32> to vector<8x32xf32>
    %124 = arith.subf %111, %123 : vector<8x32xf32>
    %cst_51 = arith.constant 9.99999974E-6 : f32
    %125 = vector.broadcast %cst_51 : f32 to vector<8x1xf32>
    %126 = arith.addf %122, %125 : vector<8x1xf32>
    %127 = math.rsqrt %126 : vector<8x1xf32>
    %128 = vector.broadcast %127 : vector<8x1xf32> to vector<8x32xf32>
    %129 = arith.mulf %124, %128 : vector<8x32xf32>
    %c0_52 = arith.constant 0 : index
    %c0_53 = arith.constant 0 : index
    %c0_54 = arith.constant 0 : index
    %130 = vector.load %arg10[%c0_52, %c0_53, %c0_54] : memref<1x1x32xf32, #tpu.memory_space<vmem>>, vector<1x1x32xf32>
    %131 = vector.shape_cast %130 : vector<1x1x32xf32> to vector<1x32xf32>
    %132 = vector.broadcast %131 : vector<1x32xf32> to vector<8x32xf32>
    %133 = arith.mulf %129, %132 : vector<8x32xf32>
    %c0_55 = arith.constant 0 : index
    %c0_56 = arith.constant 0 : index
    %c0_57 = arith.constant 0 : index
    %134 = vector.load %arg11[%c0_55, %c0_56, %c0_57] : memref<1x1x32xf32, #tpu.memory_space<vmem>>, vector<1x1x32xf32>
    %135 = vector.shape_cast %134 : vector<1x1x32xf32> to vector<1x32xf32>
    %136 = vector.broadcast %135 : vector<1x32xf32> to vector<8x32xf32>
    %137 = arith.addf %133, %136 : vector<8x32xf32>
    %138 = arith.truncf %137 : vector<8x32xf32> to vector<8x32xbf16>
    %c0_58 = arith.constant 0 : index
    %c0_59 = arith.constant 0 : index
    %c0_60 = arith.constant 0 : index
    %139 = vector.load %arg12[%c0_58, %c0_59, %c0_60] : memref<1x32x64xbf16, #tpu.memory_space<vmem>>, vector<1x32x64xbf16>
    %140 = vector.shape_cast %139 : vector<1x32x64xbf16> to vector<32x64xbf16>
    %cst_61 = arith.constant dense<0.000000e+00> : vector<8x64xf32>
    %141 = tpu.matmul %138, %140, %cst_61 {dimension_numbers = #tpu.dot_dimension_numbers<[1], [0], [0], [1], [0, 0, 1, 1], [], []>} : vector<8x32xbf16>, vector<32x64xbf16>, vector<8x64xf32> -> vector<8x64xf32>
    %c0_62 = arith.constant 0 : index
    %c0_63 = arith.constant 0 : index
    %c0_64 = arith.constant 0 : index
    %142 = vector.load %arg13[%c0_62, %c0_63, %c0_64] : memref<1x1x64xf32, #tpu.memory_space<vmem>>, vector<1x1x64xf32>
    %143 = vector.shape_cast %142 : vector<1x1x64xf32> to vector<1x64xf32>
    %144 = vector.broadcast %143 : vector<1x64xf32> to vector<8x64xf32>
    %145 = arith.addf %141, %144 : vector<8x64xf32>
    %cst_65 = arith.constant 0.000000e+00 : f32
    %146 = vector.broadcast %cst_65 : f32 to vector<8x64xf32>
    %147 = arith.maximumf %145, %146 : vector<8x64xf32>
    %148 = arith.truncf %147 : vector<8x64xf32> to vector<8x64xbf16>
    %c0_66 = arith.constant 0 : index
    %c0_67 = arith.constant 0 : index
    %c0_68 = arith.constant 0 : index
    %149 = vector.load %arg14[%c0_66, %c0_67, %c0_68] : memref<1x64x32xbf16, #tpu.memory_space<vmem>>, vector<1x64x32xbf16>
    %150 = vector.shape_cast %149 : vector<1x64x32xbf16> to vector<64x32xbf16>
    %cst_69 = arith.constant dense<0.000000e+00> : vector<8x32xf32>
    %151 = tpu.matmul %148, %150, %cst_69 {dimension_numbers = #tpu.dot_dimension_numbers<[1], [0], [0], [1], [0, 0, 1, 1], [], []>} : vector<8x64xbf16>, vector<64x32xbf16>, vector<8x32xf32> -> vector<8x32xf32>
    %c0_70 = arith.constant 0 : index
    %c0_71 = arith.constant 0 : index
    %c0_72 = arith.constant 0 : index
    %152 = vector.load %arg15[%c0_70, %c0_71, %c0_72] : memref<1x1x32xf32, #tpu.memory_space<vmem>>, vector<1x1x32xf32>
    %153 = vector.shape_cast %152 : vector<1x1x32xf32> to vector<1x32xf32>
    %154 = vector.broadcast %153 : vector<1x32xf32> to vector<8x32xf32>
    %155 = arith.addf %151, %154 : vector<8x32xf32>
    %156 = arith.addf %137, %155 : vector<8x32xf32>
    %cst_73 = arith.constant dense<0.000000e+00> : vector<8xf32>
    %157 = vector.multi_reduction <add>, %156, %cst_73 [1] : vector<8x32xf32> to vector<8xf32>
    %158 = vector.shape_cast %157 : vector<8xf32> to vector<8x1xf32>
    %cst_74 = arith.constant 3.200000e+01 : f32
    %159 = vector.broadcast %cst_74 : f32 to vector<8x1xf32>
    %160 = arith.divf %158, %159 : vector<8x1xf32>
    %161 = vector.broadcast %160 : vector<8x1xf32> to vector<8x32xf32>
    %162 = arith.subf %156, %161 : vector<8x32xf32>
    %163 = arith.mulf %162, %162 : vector<8x32xf32>
    %cst_75 = arith.constant dense<0.000000e+00> : vector<8xf32>
    %164 = vector.multi_reduction <add>, %163, %cst_75 [1] : vector<8x32xf32> to vector<8xf32>
    %165 = vector.shape_cast %164 : vector<8xf32> to vector<8x1xf32>
    %cst_76 = arith.constant 3.200000e+01 : f32
    %166 = vector.broadcast %cst_76 : f32 to vector<8x1xf32>
    %167 = arith.divf %165, %166 : vector<8x1xf32>
    %168 = vector.broadcast %160 : vector<8x1xf32> to vector<8x32xf32>
    %169 = arith.subf %156, %168 : vector<8x32xf32>
    %cst_77 = arith.constant 9.99999974E-6 : f32
    %170 = vector.broadcast %cst_77 : f32 to vector<8x1xf32>
    %171 = arith.addf %167, %170 : vector<8x1xf32>
    %172 = math.rsqrt %171 : vector<8x1xf32>
    %173 = vector.broadcast %172 : vector<8x1xf32> to vector<8x32xf32>
    %174 = arith.mulf %169, %173 : vector<8x32xf32>
    %c0_78 = arith.constant 0 : index
    %c0_79 = arith.constant 0 : index
    %c0_80 = arith.constant 0 : index
    %175 = vector.load %arg16[%c0_78, %c0_79, %c0_80] : memref<1x1x32xf32, #tpu.memory_space<vmem>>, vector<1x1x32xf32>
    %176 = vector.shape_cast %175 : vector<1x1x32xf32> to vector<1x32xf32>
    %177 = vector.broadcast %176 : vector<1x32xf32> to vector<8x32xf32>
    %178 = arith.mulf %174, %177 : vector<8x32xf32>
    %c0_81 = arith.constant 0 : index
    %c0_82 = arith.constant 0 : index
    %c0_83 = arith.constant 0 : index
    %179 = vector.load %arg17[%c0_81, %c0_82, %c0_83] : memref<1x1x32xf32, #tpu.memory_space<vmem>>, vector<1x1x32xf32>
    %180 = vector.shape_cast %179 : vector<1x1x32xf32> to vector<1x32xf32>
    %181 = vector.broadcast %180 : vector<1x32xf32> to vector<8x32xf32>
    %182 = arith.addf %178, %181 : vector<8x32xf32>
    %c0_84 = arith.constant 0 : index
    %c0_85 = arith.constant 0 : index
    %183 = vector.load %arg18[%c0_84, %c0_85] : memref<8x32xf32, #tpu.memory_space<vmem>>, vector<8x32xf32>
    tpu.vector_store %arg18[%c0_84, %c0_85], %182 {strides = array<i32>} : memref<8x32xf32, #tpu.memory_space<vmem>>, vector<8x32xf32>,
    return
  }
  func.func @transform_0(%arg0: i32, %arg1: i32) -> (i32, i32) {
    %c0_i32 = arith.constant 0 : i32
    %c0_i32_0 = arith.constant 0 : i32
    return %arg0, %c0_i32 : i32, i32
  }
  func.func @transform_1(%arg0: i32, %arg1: i32) -> (i32, i32) {
    %c0_i32 = arith.constant 0 : i32
    %c0_i32_0 = arith.constant 0 : i32
    return %arg0, %c0_i32 : i32, i32
  }
  func.func @transform_2(%arg0: i32, %arg1: i32) -> (i32, i32, i32) {
    %c0_i32 = arith.constant 0 : i32
    %c0_i32_0 = arith.constant 0 : i32
    %c0_i32_1 = arith.constant 0 : i32
    return %arg1, %c0_i32, %c0_i32_0 : i32, i32, i32
  }
  func.func @transform_3(%arg0: i32, %arg1: i32) -> (i32, i32, i32) {
    %c0_i32 = arith.constant 0 : i32
    %c0_i32_0 = arith.constant 0 : i32
    %c0_i32_1 = arith.constant 0 : i32
    return %arg1, %c0_i32, %c0_i32_0 : i32, i32, i32
  }
  func.func @transform_4(%arg0: i32, %arg1: i32) -> (i32, i32, i32) {
    %c0_i32 = arith.constant 0 : i32
    %c0_i32_0 = arith.constant 0 : i32
    %c0_i32_1 = arith.constant 0 : i32
    return %arg1, %c0_i32, %c0_i32_0 : i32, i32, i32
  }
  func.func @transform_5(%arg0: i32, %arg1: i32) -> (i32, i32, i32) {
    %c0_i32 = arith.constant 0 : i32
    %c0_i32_0 = arith.constant 0 : i32
    %c0_i32_1 = arith.constant 0 : i32
    return %arg1, %c0_i32, %c0_i32_0 : i32, i32, i32
  }
  func.func @transform_6(%arg0: i32, %arg1: i32) -> (i32, i32, i32) {
    %c0_i32 = arith.constant 0 : i32
    %c0_i32_0 = arith.constant 0 : i32
    %c0_i32_1 = arith.constant 0 : i32
    return %arg1, %c0_i32, %c0_i32_0 : i32, i32, i32
  }
  func.func @transform_7(%arg0: i32, %arg1: i32) -> (i32, i32, i32) {
    %c0_i32 = arith.constant 0 : i32
    %c0_i32_0 = arith.constant 0 : i32
    %c0_i32_1 = arith.constant 0 : i32
    return %arg1, %c0_i32, %c0_i32_0 : i32, i32, i32
  }
  func.func @transform_8(%arg0: i32, %arg1: i32) -> (i32, i32, i32) {
    %c0_i32 = arith.constant 0 : i32
    %c0_i32_0 = arith.constant 0 : i32
    %c0_i32_1 = arith.constant 0 : i32
    return %arg1, %c0_i32, %c0_i32_0 : i32, i32, i32
  }
  func.func @transform_9(%arg0: i32, %arg1: i32) -> (i32, i32, i32) {
    %c0_i32 = arith.constant 0 : i32
    %c0_i32_0 = arith.constant 0 : i32
    %c0_i32_1 = arith.constant 0 : i32
    return %arg1, %c0_i32, %c0_i32_0 : i32, i32, i32
  }
  func.func @transform_10(%arg0: i32, %arg1: i32) -> (i32, i32, i32) {
    %c0_i32 = arith.constant 0 : i32
    %c0_i32_0 = arith.constant 0 : i32
    %c0_i32_1 = arith.constant 0 : i32
    return %arg1, %c0_i32, %c0_i32_0 : i32, i32, i32
  }
  func.func @transform_11(%arg0: i32, %arg1: i32) -> (i32, i32, i32) {
    %c0_i32 = arith.constant 0 : i32
    %c0_i32_0 = arith.constant 0 : i32
    %c0_i32_1 = arith.constant 0 : i32
    return %arg1, %c0_i32, %c0_i32_0 : i32, i32, i32
  }
  func.func @transform_12(%arg0: i32, %arg1: i32) -> (i32, i32, i32) {
    %c0_i32 = arith.constant 0 : i32
    %c0_i32_0 = arith.constant 0 : i32
    %c0_i32_1 = arith.constant 0 : i32
    return %arg1, %c0_i32, %c0_i32_0 : i32, i32, i32
  }
  func.func @transform_13(%arg0: i32, %arg1: i32) -> (i32, i32, i32) {
    %c0_i32 = arith.constant 0 : i32
    %c0_i32_0 = arith.constant 0 : i32
    %c0_i32_1 = arith.constant 0 : i32
    return %arg1, %c0_i32, %c0_i32_0 : i32, i32, i32
  }
  func.func @transform_14(%arg0: i32, %arg1: i32) -> (i32, i32, i32) {
    %c0_i32 = arith.constant 0 : i32
    %c0_i32_0 = arith.constant 0 : i32
    %c0_i32_1 = arith.constant 0 : i32
    return %arg1, %c0_i32, %c0_i32_0 : i32, i32, i32
  }
  func.func @transform_15(%arg0: i32, %arg1: i32) -> (i32, i32, i32) {
    %c0_i32 = arith.constant 0 : i32
    %c0_i32_0 = arith.constant 0 : i32
    %c0_i32_1 = arith.constant 0 : i32
    return %arg1, %c0_i32, %c0_i32_0 : i32, i32, i32
  }
  func.func @transform_16(%arg0: i32, %arg1: i32) -> (i32, i32) {
    %c0_i32 = arith.constant 0 : i32
    %c0_i32_0 = arith.constant 0 : i32
    return %arg0, %c0_i32 : i32, i32
  }
}

</mosaic_0001>

<bundles_post_ra>
// kernel: tpu_custom_call.1
= control target key start
LH: loop header
LB: loop body
LE: loop exit
PB: predicated region body
PF: predicated region fallthrough
CT: control target
= control target key end

     0   :  { %s3246_s0 = inlined_call_operand.hbm [shape: f32[16,32], index: 0, kind: input, shape index: {}]   ;;  %s3247_s1 = inlined_call_operand.hbm [shape: f32[16,32], index: 1, kind: input, shape index: {}]   ;;  %s3248_s2 = inlined_call_operand.vmem [shape: bf16[2,32,64], index: 2, kind: input, shape index: {}]   ;;  %s3249_s3 = inlined_call_operand.vmem [shape: f32[2,1,64], index: 3, kind: input, shape index: {}]   ;;  %s3250_s4 = inlined_call_operand.vmem [shape: bf16[2,32,32], index: 4, kind: input, shape index: {}]   ;;  %s3251_s5 = inlined_call_operand.vmem [shape: f32[2,1,32], index: 5, kind: input, shape index: {}]   ;;  %s3252_s6 = inlined_call_operand.vmem [shape: bf16[2,32,32], index: 6, kind: input, shape index: {}]   ;;  %s3253_s7 = inlined_call_operand.vmem [shape: f32[2,1,32], index: 7, kind: input, shape index: {}]   ;;  %s3254_s8 = inlined_call_operand.vmem [shape: f32[2,1,32], index: 8, kind: input, shape index: {}]   ;;  %s3255_s9 = inlined_call_operand.vmem [shape: f32[2,1,32], index: 9, kind: input, shape index: {}]   ;;  %s3256_s10 = inlined_call_operand.hbm [shape: bf16[2,32,64], index: 10, kind: input, shape index: {}]   ;;  %s3257_s11 = inlined_call_operand.vmem [shape: f32[2,1,64], index: 11, kind: input, shape index: {}]   ;;  %s3258_s12 = inlined_call_operand.vmem [shape: bf16[2,64,32], index: 12, kind: input, shape index: {}]   ;;  %s3259_s13 = inlined_call_operand.vmem [shape: f32[2,1,32], index: 13, kind: input, shape index: {}]   ;;  %s3260_s14 = inlined_call_operand.vmem [shape: f32[2,1,32], index: 14, kind: input, shape index: {}]   ;;  %s3261_s15 = inlined_call_operand.vmem [shape: f32[2,1,32], index: 15, kind: input, shape index: {}]   ;;  %s3262_s16 = inlined_call_operand.hbm [shape: f32[16,32], index: 16, kind: output, shape index: {}]  }
   0x1   :  { %3286 = sst [smem:[#allocation29_spill]] %s3246_s0 }
   0x2   :  { %3287 = sst [smem:[#allocation30_spill]] %s3247_s1 }
   0x3   :  { %3288 = sst [smem:[#allocation31_spill]] %s3248_s2 }
   0x4   :  { %3289 = sst [smem:[#allocation32_spill]] %s3250_s4 }
   0x5   :  { %3290 = sst [smem:[#allocation33_spill]] %s3251_s5 }
   0x6   :  { %3291 = sst [smem:[#allocation34_spill]] %s3252_s6 }
   0x7   :  { %3292 = sst [smem:[#allocation35_spill]] %s3253_s7 }
   0x8   :  { %3293 = sst [smem:[#allocation36_spill]] %s3254_s8 }
   0x9   :  { %3294 = sst [smem:[#allocation37_spill]] %s3255_s9 }
   0xa   :  { %3295 = sst [smem:[#allocation38_spill]] %s3256_s10 }
   0xb   :  { %3296 = sst [smem:[#allocation39_spill]] %s3257_s11 }
   0xc   :  { %3297 = sst [smem:[#allocation40_spill]] %s3258_s12 }
   0xd   :  { %3298 = sst [smem:[#allocation41_spill]] %s3259_s13 }
   0xe   :  { %3299 = sst [smem:[#allocation42_spill]] %s3260_s14 }
   0xf   :  { %3300 = sst [smem:[#allocation43_spill]] %s3261_s15 }
  0x10   :  { %3301 = sst [smem:[#allocation44_spill]] %s3262_s16 }
  0x11   :  { %21 = vsyncpa [#allocation4], 0 }
  0x12   :  { %23 = vsyncpa [#allocation4 + $0x1], 0 }
  0x13   :  { %24 = vsyncpa [#allocation7], 0 }
  0x14   :  { %26 = vsyncpa [#allocation7 + $0x1], 0 }
  0x15   :  { %27 = vsyncpa [#allocation5], 0 }
  0x16   :  { %29 = vsyncpa [#allocation5 + $0x1], 0  ;;  %s2661_s21 = smov 0   ;;  %s2663_s22 = smov 0  }
  0x17   :  { %s2665_s23 = smov 0   ;;  %s2667_s24 = smov 0  }
  0x18   :  { %s2669_s25 = smov 0   ;;  %s2671_s26 = smov 0  }
  0x19   :  { %s2673_s27 = smov 0   ;;  %s2675_s28 = smov 0  }
  0x1a   :  { %s2677_s29 = smov 0   ;;  %s2679_s30 = smov 0  }
  0x1b   :  { %s2681_s0 = smov 0  }
  0x1c LB: > { %3302 = sst [smem:[#allocation14_spill]] %s2520_s22  ;;  %s2717_s17 = sadd.s32 4294967295, %s2556_s0   ;;  %s2556_s0 = sphi %s2681_s0, %s35_s0   ;;  %s2552_s30 = sphi %s2679_s30, %s3381_s30   ;;  %s2548_s29 = sphi %s2677_s29, %s3380_s29   ;;  %s2544_s28 = sphi %s2675_s28, %s3379_s28   ;;  %s2540_s27 = sphi %s2673_s27, %s3378_s27   ;;  %s2536_s26 = sphi %s2671_s26, %s3377_s26   ;;  %s2532_s25 = sphi %s2669_s25, %s3376_s25   ;;  %s2528_s24 = sphi %s2667_s24, %s3375_s24   ;;  %s2524_s23 = sphi %s2665_s23, %s3374_s23   ;;  %s2520_s22 = sphi %s2663_s22, %s3373_s22   ;;  %s2516_s21 = sphi %s2661_s21, %s3372_s21  }
  0x1d   : > { %3303 = sst [smem:[#allocation15_spill]] %s2524_s23  ;;  %s1986_s18 = sadd.s32 4294967294, %s2556_s0  }
  0x1e   : > { %3304 = sst [smem:[#allocation16_spill]] %s2528_s24  ;;  %s44_s19 = sadd.s32 1, %s2548_s29 }
  0x1f   : > { %3305 = sst [smem:[#allocation17_spill]] %s2532_s25  ;;  %s47_s20 = sadd.s32 1, %s2552_s30 }
  0x20   : > { %3306 = sst [smem:[#allocation18_spill]] %s2536_s26  ;;  %p45_p0 = scmp.ge.s32.totalorder %s44_s19, 2 }
  0x21   : > { %3307 = sst [smem:[#allocation19_spill]] %s2544_s28  ;;  %s54_s16 = sadd.s32 1, %s2536_s26 }
  0x22   : > { %3308 = sst [smem:[#allocation20_spill]] %s2548_s29  ;;  %p61_p1 = scmp.ne.s32.totalorder %s2536_s26, %s2532_s25 }
  0x23   : > { %3309 = sst [smem:[#allocation21_spill]] %s2552_s30  ;;  %p62_p2 = scmp.eq.s32.totalorder %s2556_s0, 0 }
  0x24   : > { %3310 = sst [smem:[#allocation22_spill]] %s2556_s0  ;;  %s3383_s19 = smov (%p45_p0, %s44_s19), 0 }
  0x25   : > { %3311 = sst [smem:[#allocation23_spill]] %s3383_s19  ;;  %s3385_s20 = smov (!%p45_p0, %s47_s20), %s2552_s30 }
  0x26   : > { %p2734_p3 = por %p62_p2, %p61_p1  ;;  %p3266_p4 = scmp.ne.s32.totalorder %s2532_s25, %s2528_s24 }
  0x27   : > { %p49_p5 = scmp.ge.s32.totalorder %s3385_s20, 2  ;;  %p68_p6 = scmp.eq.s32.totalorder %s2717_s17, 0 }
  0x28   : > { %s311_s15 = ssub.s32 %s2548_s29, %s3383_s19  ;;  %s314_s14 = sadd.s32 1, %s2524_s23 }
  0x29   : > { %s3387_s20 = smov (%p49_p5, %s3385_s20), 0  ;;  %p2751_p7 = por %p68_p6, %p3266_p4 }
  0x2a   : > { %3313 = sst [smem:[#allocation24_spill]] %s3387_s20  ;;  %p312_p8 = scmp.eq.s32.totalorder %s311_s15, 0 }
  0x2b   : > { %s3314_s12 = scalar_select %p2751_p7, 1, 0 }
  0x2c   : > { %s51_s13 = ssub.s32 %s2552_s30, %s3387_s20  ;;  %p321_p9 = scmp.ne.s32.totalorder %s2524_s23, %s2520_s22 }
  0x2d   : > { %p52_p10 = scmp.eq.s32.totalorder %s51_s13, 0  ;;  %p327_p11 = scmp.ne.s32.totalorder %s2520_s22, %s2516_s21 }
  0x2e   : > { %s2762_s19 = scalar_select %p312_p8, %s2524_s23, %s314_s14  }
  0x2f   : > { %s2765_s11 = scalar_select %p52_p10, %s2536_s26, %s54_s16  }
  0x30   : > { %3315 = sst [smem:[#allocation25_spill]] %s2762_s19  ;;  %p2769_p12 = por %p321_p9, %p62_p2 }
  0x31   : > { %3316 = sst [smem:[#allocation26_spill]] %s2765_s11  ;;  %p2775_p13 = por %p327_p11, %p68_p6 }
  0x32   : > { %p481_p0 = scmp.eq.s32.totalorder %s2717_s17, 3  ;;  %p487_p5 = scmp.eq.s32.totalorder %s1986_s18, 3 }
  0x33   : > { %s3318_s15 = scalar_select %p2775_p13, 1, 0 }
  0x34   : > { %p2200_p4 = scmp.lt.s32.totalorder %s2556_s0, 4  ;;  %p2784_p7 = por %p481_p0, %p61_p1 }
  0x35   : > { %p3321_p8 = scmp.ne.s32.totalorder %s2532_s25, %s2528_s24  ;;  %s3272_s16 = sand.u32 1, %s2536_s26  }
  0x36   : > { %s3319_s13 = scalar_select %p2784_p7, 1, 0 }
  0x37   : > { %p2791_p10 = por %p487_p5, %p3321_p8  ;;  %s3274_s21 = sshll.u32 %s2552_s30, 7 }
  0x38   : > { %3320 = sst [smem:[#allocation27_spill]] %s3319_s13  ;;  %s2799_s20 = sshll.u32 %s3272_s16, 3 }
  0x39   : > { %s3322_s14 = scalar_select %p2791_p10, 1, 0 }
  0x3a   : > { %p2803_p2 = pnand %p2200_p4, %p2734_p3  ;;  %s525_s11 = sand.u32 1, %s2556_s0  }
  0x3b   : > { %3323 = sst [smem:[#allocation28_spill]] %s3322_s14  ;;  %s3325_s1 = sld [smem:[#allocation30_spill]] }
  0x3c   : > { %s529_s16 = scalar_lea.vmem [#allocation6], %s2799_s20  ;;  %p2820_p1 = pnand %p2200_p4, %p2769_p12 }
  0x3d   : > { %s536_s28 = sshll.u32 %s529_s16, 4  ;;  %s2824_s8 = scalar_lea.sflag [#allocation7], %s525_s11  ;;  %s2816_s28 = int_to_ptr.vmem [resolvable:$true] %s536_s28 }
  0x3e   : > { %p2338_p6 = pneg %p2803_p2 }
  0x41   : > { %s2813_s13 = scalar_lea.hbm %s3325_s1, %s3274_s21  ;;  %s2341_s16 = scalar_lea.hbm %s3325_s1, 256 }
  0x42   : > { %s2336_s7 = scalar_lea.hbm %s2813_s13, 128  ;;  %p2342_p4 = scmp.lt.u32.totalorder %s2813_s13, %s3325_s1 }
  0x43   : > { %p2337_p3 = scmp.ne.s32.totalorder %s2813_s13, %s2336_s7  ;;  %p2343_p12 = scmp.lt.u32.totalorder %s2341_s16, %s2336_s7 }
  0x44   : > { %p2345_p5 = scmp.lt.u32.totalorder %s2336_s7, %s2813_s13 }
  0x45   : > { %p2339_p9 = pnand %p2338_p6, %p2337_p3  ;;  %p2344_p0 = por %p2343_p12, %p2342_p4 }
  0x47   : > { %p2340_p11 = pneg %p2339_p9  ;;  %p2346_p8 = por %p2345_p5, %p2344_p0 }
  0x49   : > { %p2347_p10 = pnand %p2346_p8, %p2340_p11 }
  0x4b   : > { %2350 = shalt.err (!%p2347_p10)
}
  0x4c   : > { %s2351_s11 = scalar_lea.vmem %s2816_s28, 128  ;;  %s2558_s24 = smov [#allocation6]  }
  0x4d   : > { %p2352_p3 = scmp.ne.s32.totalorder %s2816_s28, %s2351_s11  ;;  %s2356_s19 = sshll.u32 %s2558_s24, 4  ;;  %s2357_s19 = int_to_ptr.vmem [resolvable:$false] %s2356_s19 }
  0x4e   : > { %s2358_s21 = scalar_lea.vmem %s2357_s19, 256  ;;  %p2359_p13 = scmp.lt.s32.totalorder %s2816_s28, %s2357_s19 }
  0x4f   : > { %p2354_p9 = pnand %p2352_p3, %p2338_p6  ;;  %p2360_p4 = scmp.lt.s32.totalorder %s2358_s21, %s2351_s11 }
  0x51   : > { %p2355_p7 = pneg %p2354_p9  ;;  %p2361_p12 = por %p2360_p4, %p2359_p13 }
  0x53   : > { %p2362_p0 = pnand %p2361_p12, %p2355_p7 }
  0x55   : > { %2365 = shalt.err (!%p2362_p0)
}
  0x56   : > { %2192 = dma.hbm_to_vmem [thread:$0]  (!%p2803_p2), %s2813_s13, 128, %s2816_s28, %s2824_s8  }
  0x57   : > { %p1996_p10 = scmp.ge.s32.totalorder %s2556_s0, 1  ;;  %p648_p11 = scmp.lt.s32.totalorder %s2556_s0, 5 }
  0x58   : > { %s3328_s16 = sshll.u32 %s2552_s30, 7  ;;  %s3329_s24 = sld [smem:[#allocation29_spill]] }
  0x59   : > { %p2854_p5 = pnand %p1996_p10, %p648_p11  ;;  %s511_s1 = scalar_lea.vmem [#allocation3], %s2799_s20 }
  0x5a   : > { %s518_s6 = sshll.u32 %s511_s1, 4  ;;  %s599_s13 = sand.u32 1, %s2524_s23   ;;  %s2866_s6 = int_to_ptr.vmem [resolvable:$true] %s518_s6 }
  0x5b   : > { %s3327_s7 = scalar_select %p2854_p5, 1, 0 }
  0x5c   : > { %s3331_s28 = sand.u32 1, %s2536_s26  }
  0x5d   : > { %s508_s0 = scalar_lea.sflag [#allocation4], %s3331_s28 }
  0x5e   : > { %s3330_s19 = smov %s3329_s24  ;;  %s2863_s21 = scalar_lea.hbm %s3329_s24, %s3328_s16 }
  0x5f   : > { %s2366_s5 = scalar_lea.hbm %s2863_s21, 128  ;;  %s2371_s11 = scalar_lea.hbm %s3330_s19, 256 }
  0x60   : > { %p2367_p7 = scmp.ne.s32.totalorder %s2863_s21, %s2366_s5  ;;  %p2372_p3 = scmp.lt.u32.totalorder %s2863_s21, %s3330_s19 }
  0x61   : > { %p2373_p9 = scmp.lt.u32.totalorder %s2371_s11, %s2366_s5  ;;  %p2375_p12 = scmp.lt.u32.totalorder %s2366_s5, %s2863_s21 }
  0x62   : > { %p2369_p13 = pnand %p2367_p7, %p2338_p6 }
  0x63   : > { %p2374_p4 = por %p2373_p9, %p2372_p3 }
  0x64   : > { %p2370_p8 = pneg %p2369_p13 }
  0x65   : > { %p2376_p0 = por %p2375_p12, %p2374_p4 }
  0x67   : > { %p2377_p10 = pnand %p2376_p0, %p2370_p8 }
  0x69   : > { %2380 = shalt.err (!%p2377_p10)
}
  0x6a   : > { %s2381_s1 = scalar_lea.vmem %s2866_s6, 128  ;;  %s2559_s20 = smov [#allocation3]  }
  0x6b   : > { %p2382_p11 = scmp.ne.s32.totalorder %s2866_s6, %s2381_s1  ;;  %s2386_s28 = sshll.u32 %s2559_s20, 4  ;;  %s2387_s28 = int_to_ptr.vmem [resolvable:$false] %s2386_s28 }
  0x6c   : > { %s2388_s30 = scalar_lea.vmem %s2387_s28, 256  ;;  %p2389_p5 = scmp.lt.s32.totalorder %s2866_s6, %s2387_s28 }
  0x6d   : > { %p2384_p7 = pnand %p2382_p11, %p2338_p6  ;;  %p2390_p3 = scmp.lt.s32.totalorder %s2388_s30, %s2381_s1 }
  0x6f   : > { %p2385_p13 = pneg %p2384_p7  ;;  %p2391_p9 = por %p2390_p3, %p2389_p5 }
  0x71   : > { %p2392_p4 = pnand %p2391_p9, %p2385_p13 }
  0x73   : > { %2395 = shalt.err (!%p2392_p4)
}
  0x74   : > { %2189 = dma.hbm_to_vmem [thread:$0]  (!%p2803_p2), %s2863_s21, 128, %s2866_s6, %s508_s0  }
  0x75   : > { %s1993_s5 = sshll.u32 %s599_s13, 4  ;;  %s2048_s9 = sshll.u32 %s2548_s29, 8 }
  0x76   : > { %s3332_s10 = sld [smem:[#allocation38_spill]]  ;;  %s601_s18 = scalar_lea.vmem [#allocation8], %s1993_s5 }
  0x77   : > { %s608_s1 = sshll.u32 %s601_s18, 4  ;;  %p2398_p2 = pneg %p2820_p1  ;;  %s2902_s1 = int_to_ptr.vmem [resolvable:$true] %s608_s1 }
  0x7c   : > { %s2900_s24 = scalar_lea.hbm %s3332_s10, %s2048_s9  ;;  %s2401_s21 = scalar_lea.hbm %s3332_s10, 512 }
  0x7d   : > { %s2396_s20 = scalar_lea.hbm %s2900_s24, 256  ;;  %p2402_p12 = scmp.lt.u32.totalorder %s2900_s24, %s3332_s10 }
  0x7e   : > { %p2397_p6 = scmp.ne.s32.totalorder %s2900_s24, %s2396_s20  ;;  %p2403_p0 = scmp.lt.u32.totalorder %s2401_s21, %s2396_s20 }
  0x7f   : > { %p2405_p11 = scmp.lt.u32.totalorder %s2396_s20, %s2900_s24 }
  0x80   : > { %p2399_p5 = pnand %p2398_p2, %p2397_p6  ;;  %p2404_p10 = por %p2403_p0, %p2402_p12 }
  0x82   : > { %p2400_p8 = pneg %p2399_p5  ;;  %p2406_p7 = por %p2405_p11, %p2404_p10 }
  0x84   : > { %p2407_p13 = pnand %p2406_p7, %p2400_p8 }
  0x86   : > { %2410 = shalt.err (!%p2407_p13)
}
  0x87   : > { %s2411_s30 = scalar_lea.vmem %s2902_s1, 256  ;;  %s2560_s5 = smov [#allocation8]  }
  0x88   : > { %p2412_p3 = scmp.ne.s32.totalorder %s2902_s1, %s2411_s30  ;;  %s2416_s9 = sshll.u32 %s2560_s5, 4  ;;  %s2417_s9 = int_to_ptr.vmem [resolvable:$false] %s2416_s9 }
  0x89   : > { %s2418_s16 = scalar_lea.vmem %s2417_s9, 512  ;;  %p2419_p6 = scmp.lt.s32.totalorder %s2902_s1, %s2417_s9 }
  0x8a   : > { %p2414_p9 = pnand %p2412_p3, %p2398_p2  ;;  %p2420_p5 = scmp.lt.s32.totalorder %s2418_s16, %s2411_s30 }
  0x8c   : > { %p2415_p4 = pneg %p2414_p9  ;;  %p2421_p12 = por %p2420_p5, %p2419_p6 }
  0x8e   : > { %p2422_p0 = pnand %p2421_p12, %p2415_p4 }
  0x90   : > { %2425 = shalt.err (!%p2422_p0)
}
  0x91   : > { %s2561_s11 = smov 64   ;;  %s2562_s18 = smov 4  }
  0x92   : > { %2195 = dma.hbm_to_vmem [thread:$0]  (!%p2820_p1), %s2900_s24, 256, %s2902_s1, %s2824_s8, %s2561_s11, %s2561_s11, %s2562_s18  }
  0x93   : > { %p3333_p2 = scmp.ne.s32.totalorder %s3327_s7, 0 }
  0x94   : > { %s2933_s20 = sand.u32 (!%p3333_p2), 1, %s2532_s25   ;;  %p3334_p8 = scmp.ne.s32.totalorder (!%p3333_p2), %s3314_s12, 0 }
  0x95   : > { %652 = sbr.rel (%p3333_p2) target bundleno = 2584 (0xa18), region = 84  ;;  %s2936_s6 = sshll.u32 (!%p3333_p2), %s2933_s20, 3 }
  0x96   : > { %s655_s0 = scalar_lea.sflag (!%p3333_p2), [#allocation4], %s2933_s20 }
  0x9c   : > { %2499 = dma.done.wait (%p3334_p8), %s655_s0, 128  }
  0x9d   : > { %2501 = vsyncadd (%p3334_p8), %s655_s0, 4294967168  ;;  %s663_s8 = sand.u32 1, %s2717_s17  }
  0x9e   : > { %s664_s14 = scalar_lea.sflag [#allocation7], %s663_s8 }
  0x9f   : > { %2503 = dma.done.wait (%p3334_p8), %s664_s14, 128  }
  0xa0   : > { %2505 = vsyncadd (%p3334_p8), %s664_s14, 4294967168  ;;  %s674_s24 = sand.u32 1, %s2520_s22   ;;  %p3335_p1 = scmp.ne.s32.totalorder %s3318_s15, 0 }
  0xa1   : > { %s2951_s1 = sshll.u32 %s674_s24, 4 }
  0xa2   : > { %2507 = dma.done.wait (%p3335_p1), %s664_s14, 256  }
  0xa3   : > { %2509 = vsyncadd (%p3335_p1), %s664_s14, 4294967040  ;;  %p782_p10 = scmp.lt.s32.totalorder %s2540_s27, 1  ;;  %s3336_s2 = sld [smem:[#allocation31_spill]] }
  0xa4   : > { %s3337_s4 = sld [smem:[#allocation32_spill]]  ;;  %s3339_s10 = sld [smem:[#allocation34_spill]] }
  0xa5   : > { %s2960_s17 = scalar_select %p782_p10, %s2540_s27, 1 }
  0xa6   : > { %s3340_s30 = sld [smem:[#allocation35_spill]]  ;;  %s3343_s14 = sld [smem:[#allocation39_spill]] }
  0xa7   : > { %s2049_s12 = sshll.u32 %s2960_s17, 4  ;;  %s2052_s13 = sshll.u32 %s2960_s17, 5 }
  0xa8   : > { %s3344_s7 = sld [smem:[#allocation41_spill]]  ;;  %s3346_s9 = sld [smem:[#allocation42_spill]] }
  0xa9   : > { %s786_s16 = scalar_lea.vmem %s3336_s2, %s2049_s12  ;;  %s3347_s18 = sld [smem:[#allocation43_spill]] }
  0xaa   : > { %s2973_s0 = scalar_lea.vmem %s3337_s4, %s2049_s12  ;;  %s2982_s19 = scalar_lea.vmem %s3339_s10, %s2049_s12 }
  0xab   : > { %s3019_s23 = scalar_lea.vmem [#allocation9], %s2936_s6  ;;  %p2009_p11 = scmp.ne.s32.totalorder %s2540_s27, 0 }
  0xac   : > { %s805_s29 = scalar_lea.vmem %s3340_s30, %s2960_s17  ;;  %s814_s24 = scalar_lea.vmem %s3343_s14, %s2960_s17  ;;  %vm835_vm0 = vcmask (!%p2009_p11), 261120  }
  0xad   : > { %s3345_s30 = sld [smem:[#allocation40_spill]]  ;;  %833 = sbr.rel (%p2009_p11) target bundleno = 180 (0xb4), region = 100 }
  0xae   : > { %s822_s12 = scalar_lea.vmem %s3344_s7, %s2960_s17  ;;  %s825_s26 = scalar_lea.vmem %s3346_s9, %s2960_s17 }
  0xaf   : > { %s828_s25 = scalar_lea.vmem %s3347_s18, %s2960_s17  ;;  %s3348_s8 = scalar_lea.vmem (!%p2009_p11), [#allocation3], %s2936_s6 }
  0xb0   : > { %v834_v0 = vld [vmem:[%s3348_s8] sm:$0xff] (!%p2009_p11) }
  0xb1   : > { %836 = vst.msk [vmem:[%s3019_s23] sm:$0xff] (!%p2009_p11), %vm835_vm0, %v834_v0 }
  0xb3   : > { %s3008_s28 = scalar_lea.vmem %s3345_s30, %s2052_s13 }
  0xb4 PF: > { %v2304_v1 = vld [vmem:[%s786_s16] sm:$0xff]   ;;  %v2563_v2 = vmov 0.0   ;;  %v2305_v3 = vld [vmem:[%s786_s16 + $0x8] sm:$0xff]   ;;  %vm2564_vm1 = vmmov 0   ;;  %s3349_s22 = scalar_lea.vmem [#allocation6], %s2936_s6  ;;  %vm864_vm2 = vcmask 261120   ;;  %s3350_s13 = scalar_lea.vmem %s3249_s3, %s2960_s17 }
  0xb5   : > { %2086 = vmatprep.subr.bf16.mxu1 %v2563_v2  ;;  %2102 = vmatprep.subr.bf16.mxu0 %v2563_v2  ;;  %v838_v5 = vld [vmem:[%s3349_s22] sm:$0xff]  ;;  %v2307_v16 = vld [vmem:[%s2973_s0 + $0x8] sm:$0xff]   ;;  %s2565_s16 = smov 120   ;;  %s2566_s14 = smov 96   ;;  %vm980_vm3 = vcmask 64512   ;;  %vm1040_vm4 = vcmask 1043456  }
  0xb6   : > { %2087 = vmatpush3.bf16.msra.mxu1 %v2304_v1  ;;  %2090 = vmatprep.mubr.msk.bf16.mxu1 %vm2564_vm1, %v2563_v2  ;;  %v2010_v8 = vld [vmem:[%s3350_s13] ss:$0 sm:$0xff]  ;;  %s2567_s21 = smov 80   ;;  %s2568_s10 = smov 88   ;;  %vm1202_vm5 = vcmask 130112   ;;  %vm1318_vm6 = vcmask 195712  }
  0xb7   : > { %2088 = vmatprep.subr.bf16.mxu1 %v2563_v2  ;;  %2104 = vmatprep.mubr.msk.bf16.mxu0 %vm2564_vm1, %v2563_v2  ;;  %v2306_v13 = vld [vmem:[%s2973_s0] sm:$0xff]   ;;  %s2569_s0 = smov 72   ;;  %s2570_s7 = smov 112   ;;  %vm1434_vm7 = vcmask 261312   ;;  %vm1643_vm8 = vcmask 523264  }
  0xb8   : > { %v3030_v4 = vld [vmem:[%s3019_s23] sm:$0xff]  ;;  %s2571_s15 = smov 104   ;;  %s3351_s2 = sld [smem:[#allocation33_spill]] }
  0xb9   : > { %v839_v6 = vadd.f32 %v838_v5, %v3030_v4  ;;  %v908_v17 = vpack.c.bf16 %v3030_v4, %v3030_v4  ;;  %s2572_s11 = smov 8   ;;  %s2573_s4 = smov 16  }
  0xba   : > { %2089 = vmatpush3.bf16.msra.mxu1 %v2305_v3  ;;  %s2574_s18 = smov 24   ;;  %s3356_s13 = sld [smem:[#allocation36_spill]] }
  0xbb   : > { %v840_v7 = vpack.c.bf16 %v839_v6, %v839_v6  ;;  %2094 = vmatprep.subr.bf16.mxu1 %v2563_v2  ;;  %s3366_s6 = sld [smem:[#allocation44_spill]] }
  0xbd   : > { %2091 = vmatmul.mubr.msk.bf16.vlgmr.msra.gmra.mrb[0].mxu1 %vm864_vm2, %v840_v7 }
  0xbe   : > { %2098 = vmatprep.mubr.msk.bf16.mxu1 %vm2564_vm1, %v2563_v2  ;;  %2095 = vmatpush3.bf16.msra.mxu1 %v2306_v13  ;;  %s3352_s9 = scalar_lea.vmem %s3351_s2, %s2960_s17 }
  0xbf   : > { %2096 = vmatprep.subr.bf16.mxu1 %v2563_v2  ;;  %v2014_v29 = vld [vmem:[%s3352_s9] ss:$0 sm:$0xff] }
  0xc2   : > { %2097 = vmatpush3.bf16.msra.mxu1 %v2307_v16 }
  0xc3   : > { %2108 = vmatprep.subr.bf16.mxu1 %v2563_v2 }
  0xc5   : > { %2099 = vmatmul.mubr.msk.bf16.vlgmr.msra.gmra.mrb[4].mxu1 %vm864_vm2, %v908_v17 }
  0xc6   : > { %2110 = vmatprep.mubr.msk.bf16.mxu1 %vm2564_vm1, %v2563_v2 }
 0x190   : > { %v902_v9 = vpop.f32.mrb[0].mxu1 }
 0x191   : > { %v903_v10 = vadd.f32 %v2010_v8, %v902_v9  ;;  %v2092_v11 = vpop.f32.mrb[1].mxu1 }
 0x192   : > { %v905_v12 = vpop.f32.mrb[2].mxu1 }
 0x193   : > { %v975_v14 = vpack.c.bf16 %v903_v10, %v903_v10  ;;  %v2093_v15 = vpop.f32.mrb[3].mxu1 }
 0x195   : > { %1087 = vrot.lane.b32.xlu1 %v975_v14, %s2565_s16  ;;  %978 = vrot.lane.b32.xlu0 %v975_v14, %s2566_s14 }
 0x198   : > { %v969_v30 = vpop.f32.mrb[4].mxu1 }
 0x199   : > { %1206 = vrot.lane.b32.xlu1 %v975_v14, %s2567_s21  ;;  %1089 = vrot.lane.b32.xlu0 %v975_v14, %s2568_s10  ;;  %v970_v31 = vadd.f32 %v2014_v29, %v969_v30  ;;  %v2100_v32 = vpop.f32.mrb[5].mxu1  ;;  %s3358_s10 = sld [smem:[#allocation37_spill]] }
 0x19a   : > { %v972_v33 = vpop.f32.mrb[6].mxu1 }
 0x19b   : > { %v2101_v34 = vpop.f32.mrb[7].mxu1  ;;  %v976_v35 = vpack.c.bf16 %v970_v31, %v970_v31 }
 0x19d   : > { %1322 = vrot.lane.b32.xlu1 %v975_v14, %s2569_s0  ;;  %1204 = vrot.lane.b32.xlu0 %v975_v14, %s2570_s7  ;;  %v1042_v36 = vsel %vm1040_vm4, %v976_v35, 0 }
 0x19e   : > { %2109 = vmatpush3.bf16.msra.mxu1 %v1042_v36 }
 0x19f   : > { %2120 = vmatprep.subr.bf16.mxu1 %v2563_v2  ;;  %s3359_s0 = scalar_lea.vmem %s3358_s10, %s2960_s17 }
 0x1a1   : > { %1320 = vrot.lane.b32.xlu0 %v975_v14, %s2571_s15 }
 0x207   : > { %v979_v18 = vpop.permute.xlu0 %978  ;;  %v1088_v21 = vpop.permute.xlu1 %1087 }
 0x208   : > { %v985_v19 = vsel %vm980_vm3, %v979_v18, 0 }
 0x209   : > { %2103 = vmatpush3.bf16.xpose.msra.mxu0 %v985_v19 }
 0x20a   : > { %2114 = vmatprep.subr.bf16.mxu0 %v2563_v2 }
 0x20b   : > { %v1090_v20 = vpop.permute.xlu0 %1089  ;;  %v1207_v23 = vpop.permute.xlu1 %1206 }
 0x20c   : > { %v1095_v22 = vsel %vm980_vm3, %v1090_v20, 0  ;;  %v1212_v24 = vsel %vm980_vm3, %v1207_v23, 0 }
 0x20f   : > { %v1323_v25 = vpop.permute.xlu1 %1322  ;;  %v1205_v26 = vpop.permute.xlu0 %1204 }
 0x210   : > { %2105 = vmatmul.mubr.msk.bf16.vlgmr.msra.gmra.mrb[0].mxu0 %vm980_vm3, %v975_v14  ;;  %v1328_v27 = vsel %vm980_vm3, %v1323_v25, 0 }
 0x211   : > { %2115 = vmatpush3.bf16.xpose.msra.mxu0 %v1095_v22  ;;  %2116 = vmatprep.mubr.msk.bf16.mxu0 %vm2564_vm1, %v2563_v2 }
 0x212   : > { %2126 = vmatprep.subr.bf16.mxu0 %v2563_v2 }
 0x213   : > { %v1321_v28 = vpop.permute.xlu0 %1320 }
 0x218   : > { %2117 = vmatmul.mubr.msk.bf16.vlgmr.msra.gmra.mrb[4].mxu0 %vm980_vm3, %v1088_v21 }
 0x219   : > { %2127 = vmatpush3.bf16.xpose.msra.mxu0 %v1212_v24  ;;  %2128 = vmatprep.mubr.msk.bf16.mxu0 %vm2564_vm1, %v2563_v2 }
 0x21a   : > { %2138 = vmatprep.subr.bf16.mxu0 %v2563_v2 }
 0x220   : > { %2129 = vmatmul.mubr.msk.bf16.vlgmr.msra.gmra.mrb[8].mxu0 %vm980_vm3, %v1205_v26 }
 0x221   : > { %2139 = vmatpush3.bf16.xpose.msra.mxu0 %v1328_v27  ;;  %2140 = vmatprep.mubr.msk.bf16.mxu0 %vm2564_vm1, %v2563_v2 }
 0x222   : > { %2150 = vmatprep.subr.bf16.mxu0 %v2563_v2 }
 0x228   : > { %2141 = vmatmul.mubr.msk.bf16.vlgmr.msra.gmra.mrb[12].mxu0 %vm980_vm3, %v1321_v28 }
 0x229   : > { %2154 = vmatprep.mubr.msk.bf16.mxu0 %vm2564_vm1, %v2563_v2 }
 0x2e3   : > { %v1021_v37 = vpop.f32.mrb[0].mxu0 }
 0x2e4   : > { %v2106_v38 = vpop.f32.mrb[1].mxu0  ;;  %v1027_v39 = vsel %vm980_vm3, %v1021_v37, -inf }
 0x2e5   : > { %1028 = vmax.xlane.f32.xlu1 %v1027_v39  ;;  %v1024_v40 = vpop.f32.mrb[2].mxu0 }
 0x2e6   : > { %v2107_v41 = vpop.f32.mrb[3].mxu0 }
 0x2eb   : > { %v1131_v42 = vpop.f32.mrb[4].mxu0 }
 0x2ec   : > { %v2118_v43 = vpop.f32.mrb[5].mxu0  ;;  %v1137_v44 = vsel %vm980_vm3, %v1131_v42, -inf }
 0x2ed   : > { %1138 = vmax.xlane.f32.xlu0 %v1137_v44  ;;  %v1134_v45 = vpop.f32.mrb[6].mxu0 }
 0x2ee   : > { %v2119_v46 = vpop.f32.mrb[7].mxu0 }
 0x2f3   : > { %v1248_v47 = vpop.f32.mrb[8].mxu0 }
 0x2f4   : > { %v2130_v48 = vpop.f32.mrb[9].mxu0  ;;  %v1254_v49 = vsel %vm980_vm3, %v1248_v47, -inf }
 0x2f5   : > { %1255 = vmax.xlane.f32.xlu0 %v1254_v49  ;;  %v1251_v50 = vpop.f32.mrb[10].mxu0  ;;  %v2309_v48 = vld [vmem:[%s2982_s19 + $0x8] sm:$0xff]  }
 0x2f6   : > { %v2131_v51 = vpop.f32.mrb[11].mxu0  ;;  %1264 = vrot.lane.b32.xlu1 %v976_v35, %s2570_s7 }
 0x2fb   : > { %v1364_v52 = vpop.f32.mrb[12].mxu0 }
 0x2fc   : > { %v2142_v53 = vpop.f32.mrb[13].mxu0  ;;  %v1370_v56 = vsel %vm980_vm3, %v1364_v52, -inf }
 0x2fd   : > { %v1367_v54 = vpop.f32.mrb[14].mxu0 }
 0x2fe   : > { %v2143_v55 = vpop.f32.mrb[15].mxu0 }
 0x30b   : > { %1148 = vrot.lane.b32.xlu0 %v976_v35, %s2565_s16  ;;  %s3357_s16 = scalar_lea.vmem %s3356_s13, %s2960_s17 }
 0x31a   : > { %1371 = vmax.xlane.f32.xlu1 %v1370_v56 }
 0x32b   : > { %1380 = vrot.lane.b32.xlu1 %v976_v35, %s2571_s15 }
 0x372   : > { %v1029_v57 = vpop.xlane.xlu1 %1028 }
 0x373   : > { %v1030_v58 = vsub.f32 %v1021_v37, %v1029_v57 }
 0x375   : > { %v1031_v59 = vmul.f32 1.442695, %v1030_v58 }
 0x376   : > { %v1265_v9 = vpop.permute.xlu1 %1264 }
 0x377   : > { %2316 = vpow2.f32 %v1031_v59  ;;  %v1270_v12 = vsel %vm1040_vm4, %v1265_v9, 0 }
 0x37a   : > { %v1139_v60 = vpop.xlane.xlu0 %1138 }
 0x37b   : > { %v1140_v61 = vsub.f32 %v1131_v42, %v1139_v60  ;;  %v2026_v60 = vld [vmem:[%s805_s29] ss:$0 sm:$0xff]  ;;  %s3354_s29 = scalar_lea.vmem [#allocation8], %s2951_s1 }
 0x37c   : > { %s3355_s27 = smov %s3354_s29 }
 0x37d   : > { %v1141_v62 = vmul.f32 1.442695, %v1140_v61 }
 0x37f   : > { %2318 = vpow2.f32 %v1141_v62 }
 0x381   : > { %v2317_v63 = vpop.eup %2316 }
 0x382   : > { %v1256_v0 = vpop.xlane.xlu0 %1255  ;;  %v1036_v1 = vpack.c.bf16 %v2317_v63, %v2317_v63  ;;  %v1033_v24 = vsel %vm980_vm3, %v2317_v63, 0.0 }
 0x383   : > { %v1257_v3 = vsub.f32 %v1248_v47, %v1256_v0  ;;  %v2308_v47 = vld [vmem:[%s2982_s19] sm:$0xff]  }
 0x384   : > { %2111 = vmatmul.mubr.msk.bf16.vlgmr.msra.gmra.mrb[8].mxu1 %vm980_vm3, %v1036_v1  ;;  %2151 = vmatpush3.bf16.msra.mxu0 %v2308_v47 }
 0x385   : > { %v1258_v5 = vmul.f32 1.442695, %v1257_v3  ;;  %2122 = vmatprep.mubr.msk.bf16.mxu1 %vm2564_vm1, %v2563_v2  ;;  %2152 = vmatprep.subr.bf16.mxu0 %v2563_v2 }
 0x386   : > { %v1149_v6 = vpop.permute.xlu0 %1148 }
 0x387   : > { %2320 = vpow2.f32 %v1258_v5  ;;  %v1154_v7 = vsel %vm1040_vm4, %v1149_v6, 0 }
 0x388   : > { %2121 = vmatpush3.bf16.msra.mxu1 %v1154_v7  ;;  %2153 = vmatpush3.bf16.msra.mxu0 %v2309_v48 }
 0x389   : > { %v2319_v8 = vpop.eup %2318  ;;  %2132 = vmatprep.subr.bf16.mxu1 %v2563_v2  ;;  %2166 = vmatprep.subr.bf16.mxu0 %v2563_v2 }
 0x38a   : > { %v1143_v10 = vsel %vm980_vm3, %v2319_v8, 0.0  ;;  %v1146_v11 = vpack.c.bf16 %v2319_v8, %v2319_v8 }
 0x38b   : > { %1144 = vadd.xlane.f32.xlu0 %v1143_v10 }
 0x38c   : > { %2123 = vmatmul.mubr.msk.bf16.vlgmr.msra.gmra.mrb[12].mxu1 %vm980_vm3, %v1146_v11  ;;  %v2310_v11 = vld [vmem:[%s3354_s29] sm:$0xff]   ;;  %s1732_s29 = sshll.u32 %s3019_s23, 4  ;;  %s3183_s29 = int_to_ptr.vmem [resolvable:$true] %s1732_s29 }
 0x38d   : > { %2133 = vmatpush3.bf16.msra.mxu1 %v1270_v12  ;;  %2134 = vmatprep.mubr.msk.bf16.mxu1 %vm2564_vm1, %v2563_v2  ;;  %v2311_v12 = vld [vmem:[%s3355_s27 + $0x8] sm:$0xff]  }
 0x38e   : > { %2144 = vmatprep.subr.bf16.mxu1 %v2563_v2 }
 0x391   : > { %v2321_v13 = vpop.eup %2320 }
 0x392   : > { %v1260_v14 = vsel %vm980_vm3, %v2321_v13, 0.0  ;;  %v1263_v15 = vpack.c.bf16 %v2321_v13, %v2321_v13  ;;  %v2313_v13 = vld [vmem:[%s3008_s28 + $0x8] sm:$0xff]  }
 0x393   : > { %1261 = vadd.xlane.f32.xlu1 %v1260_v14 }
 0x394   : > { %2135 = vmatmul.mubr.msk.bf16.vlgmr.msra.gmra.mrb[16].mxu1 %vm980_vm3, %v1263_v15 }
 0x395   : > { %2146 = vmatprep.mubr.msk.bf16.mxu1 %vm2564_vm1, %v2563_v2 }
 0x3a7   : > { %v1372_v16 = vpop.xlane.xlu1 %1371 }
 0x3a8   : > { %v1373_v17 = vsub.f32 %v1364_v52, %v1372_v16 }
 0x3aa   : > { %v1374_v18 = vmul.f32 1.442695, %v1373_v17 }
 0x3ab   : > { %v1381_v19 = vpop.permute.xlu1 %1380 }
 0x3ac   : > { %2322 = vpow2.f32 %v1374_v18  ;;  %v1386_v20 = vsel %vm1040_vm4, %v1381_v19, 0  ;;  %v2030_v18 = vld [vmem:[%s3357_s16] ss:$0 sm:$0xff]  ;;  %s2426_s16 = scalar_lea.vmem %s3183_s29, 128 }
 0x3ad   : > { %2145 = vmatpush3.bf16.msra.mxu1 %v1386_v20  ;;  %v2031_v20 = vld [vmem:[%s3359_s0] ss:$0 sm:$0xff]  ;;  %p2427_p7 = scmp.ne.s32.totalorder %s3183_s29, %s2426_s16 }
 0x3ae   : > { %2158 = vmatprep.subr.bf16.mxu1 %v2563_v2 }
 0x3b6   : > { %v2323_v21 = vpop.eup %2322 }
 0x3b7   : > { %v1376_v22 = vsel %vm980_vm3, %v2323_v21, 0.0  ;;  %v1379_v23 = vpack.c.bf16 %v2323_v21, %v2323_v21 }
 0x3b8   : > { %1377 = vadd.xlane.f32.xlu0 %v1376_v22 }
 0x3b9   : > { %2147 = vmatmul.mubr.msk.bf16.vlgmr.msra.gmra.mrb[20].mxu1 %vm980_vm3, %v1379_v23 }
 0x3ba   : > { %2162 = vmatprep.mubr.msk.bf16.mxu1 %vm2564_vm1, %v2563_v2  ;;  %2159 = vmatpush3.bf16.msra.mxu1 %v2310_v11 }
 0x3bb   : > { %2160 = vmatprep.subr.bf16.mxu1 %v2563_v2 }
 0x3bc   : > { %1034 = vadd.xlane.f32.xlu0 %v1033_v24  ;;  %v2314_v24 = vld [vmem:[%s3008_s28 + $0x10] sm:$0xff]  }
 0x3be   : > { %2161 = vmatpush3.bf16.msra.mxu1 %v2311_v12 }
 0x418   : > { %v1145_v25 = vpop.xlane.xlu0 %1144 }
 0x420   : > { %v1262_v33 = vpop.xlane.xlu1 %1261 }
 0x445   : > { %v1378_v26 = vpop.xlane.xlu0 %1377 }
 0x449   : > { %v1035_v27 = vpop.xlane.xlu0 %1034 }
 0x44a   : > { %2324 = vrcp.f32 %v1035_v27 }
 0x44b   : > { %2326 = vrcp.f32 %v1145_v25  ;;  %v2315_v25 = vld [vmem:[%s3008_s28 + $0x18] sm:$0xff]  }
 0x44c   : > { %2328 = vrcp.f32 %v1262_v33 }
 0x44d   : > { %2330 = vrcp.f32 %v1378_v26  ;;  %v2032_v26 = vld [vmem:[%s814_s24] ss:$0 sm:$0xff]  ;;  %s3362_s24 = sld [smem:[#allocation19_spill]] }
 0x453   : > { %s2045_s22 = sshll.u32 %s3362_s24, 7 }
 0x454   : > { %v2325_v28 = vpop.eup %2324  ;;  %s3181_s13 = scalar_lea.hbm %s3366_s6, %s2045_s22 }
 0x455   : > { %v2327_v35 = vpop.eup %2326 }
 0x456   : > { %v2329_v41 = vpop.eup %2328 }
 0x457   : > { %v1078_v29 = vpop.f32.mrb[8].mxu1  ;;  %v2331_v49 = vpop.eup %2330 }
 0x458   : > { %v1085_v30 = vmul.f32 %v2325_v28, %v1078_v29  ;;  %v2112_v31 = vpop.f32.mrb[9].mxu1 }
 0x459   : > { %v1081_v32 = vpop.f32.mrb[10].mxu1 }
 0x45a   : > { %1086 = vst.msk [vmem:[#allocation2] sm:$0xff] %vm980_vm3, %v1085_v30  ;;  %v2113_v34 = vpop.f32.mrb[11].mxu1 }
 0x45f   : > { %v1190_v36 = vpop.f32.mrb[12].mxu1 }
 0x460   : > { %v1197_v37 = vmul.f32 %v2327_v35, %v1190_v36  ;;  %v2124_v38 = vpop.f32.mrb[13].mxu1 }
 0x461   : > { %v1193_v39 = vpop.f32.mrb[14].mxu1 }
 0x462   : > { %1199 = vrot.lane.b32.xlu1 %v1197_v37, %s2572_s11  ;;  %v2125_v40 = vpop.f32.mrb[15].mxu1 }
 0x467   : > { %v1306_v42 = vpop.f32.mrb[16].mxu1 }
 0x468   : > { %v1313_v43 = vmul.f32 %v2329_v41, %v1306_v42  ;;  %v2136_v44 = vpop.f32.mrb[17].mxu1 }
 0x469   : > { %v1309_v45 = vpop.f32.mrb[18].mxu1 }
 0x46a   : > { %1315 = vrot.lane.b32.xlu0 %v1313_v43, %s2573_s4  ;;  %v2137_v46 = vpop.f32.mrb[19].mxu1 }
 0x48c   : > { %v1422_v50 = vpop.f32.mrb[20].mxu1 }
 0x48d   : > { %v1429_v51 = vmul.f32 %v2331_v49, %v1422_v50  ;;  %v2148_v52 = vpop.f32.mrb[21].mxu1  ;;  %v2042_v50 = vld [vmem:[%s825_s26] ss:$0 sm:$0xff]  ;;  %s1719_s26 = scalar_lea.sflag [#allocation5], %s2933_s20 }
 0x48e   : > { %v1425_v53 = vpop.f32.mrb[22].mxu1  ;;  %v2043_v52 = vld [vmem:[%s828_s25] ss:$0 sm:$0xff]  ;;  %s2575_s25 = smov [#allocation9]  }
 0x48f   : > { %1431 = vrot.lane.b32.xlu1 %v1429_v51, %s2574_s18  ;;  %v2149_v54 = vpop.f32.mrb[23].mxu1  ;;  %s2430_s17 = sshll.u32 %s2575_s25, 4  ;;  %s2431_s17 = int_to_ptr.vmem [resolvable:$false] %s2430_s17 }
 0x490   : > { %s2432_s14 = scalar_lea.vmem %s2431_s17, 256  ;;  %p2433_p4 = scmp.lt.s32.totalorder %s3183_s29, %s2431_s17 }
 0x491   : > { %p2434_p6 = scmp.lt.s32.totalorder %s2432_s14, %s2426_s16 }
 0x493   : > { %p2435_p5 = por %p2434_p6, %p2433_p4 }
 0x4d4   : > { %v1200_v55 = vpop.permute.xlu1 %1199 }
 0x4d5   : > { %1203 = vst.msk [vmem:[#allocation2] sm:$0xff] %vm1202_vm5, %v1200_v55 }
 0x4dc   : > { %v1316_v56 = vpop.permute.xlu0 %1315 }
 0x4dd   : > { %1319 = vst.msk [vmem:[#allocation2] sm:$0xff] %vm1318_vm6, %v1316_v56 }
 0x501   : > { %v1432_v57 = vpop.permute.xlu1 %1431 }
 0x502   : > { %1435 = vst.msk [vmem:[#allocation2] sm:$0xff] %vm1434_vm7, %v1432_v57 }
 0x509   : > { %v1436_v58 = vld [vmem:[#allocation2] sm:$0xff] }
 0x50a   : > { %v1437_v59 = vpack.c.bf16 %v1436_v58, %v1436_v58 }
 0x50c   : > { %2155 = vmatmul.mubr.msk.bf16.vlgmr.msra.gmra.mrb[16].mxu0 %vm864_vm2, %v1437_v59 }
 0x50d   : > { %2174 = vmatprep.mubr.msk.bf16.mxu0 %vm2564_vm1, %v2563_v2 }
 0x5df   : > { %v1498_v61 = vpop.f32.mrb[16].mxu0 }
 0x5e0   : > { %v1499_v62 = vadd.f32 %v2026_v60, %v1498_v61  ;;  %v2156_v63 = vpop.f32.mrb[17].mxu0 }
 0x5e1   : > { %v1501_v0 = vpop.f32.mrb[18].mxu0 }
 0x5e2   : > { %v2157_v1 = vpop.f32.mrb[19].mxu0  ;;  %v1504_v3 = vadd.f32 %v1499_v62, %v3030_v4  ;;  %v2312_v4 = vld [vmem:[%s3008_s28] sm:$0xff]  }
 0x5e3   : > { %2167 = vmatpush3.bf16.msra.mxu0 %v2312_v4 }
 0x5e4   : > { %v1505_v5 = vsel %vm864_vm2, %v1504_v3, 0.0  ;;  %2168 = vmatprep.subr.bf16.mxu0 %v2563_v2 }
 0x5e5   : > { %1506 = vadd.xlane.f32.xlu1 %v1505_v5 }
 0x5e7   : > { %2169 = vmatpush3.bf16.msra.mxu0 %v2313_v13 }
 0x5e8   : > { %2170 = vmatprep.subr.bf16.mxu0 %v2563_v2 }
 0x5eb   : > { %2171 = vmatpush3.bf16.msra.mxu0 %v2314_v24 }
 0x5ec   : > { %2172 = vmatprep.subr.bf16.mxu0 %v2563_v2  ;;  %v2036_v2 = vld [vmem:[%s822_s12] ss:$0 sm:$0xff]  ;;  %s3363_s12 = sld [smem:[#allocation27_spill]] }
 0x5ef   : > { %2173 = vmatpush3.bf16.msra.mxu0 %v2315_v25 }
 0x5f2   : > { %p3367_p13 = scmp.ne.s32.totalorder %s3363_s12, 0 }
 0x5f4   : > { %p2428_p3 = pnand %p2427_p7, %p3367_p13 }
 0x5f6   : > { %p2429_p9 = pneg %p2428_p3 }
 0x5f8   : > { %p2436_p12 = pnand %p2435_p5, %p2429_p9 }
 0x672   : > { %v1507_v6 = vpop.xlane.xlu1 %1506 }
 0x673   : > { %v1509_v7 = vmul.f32 0.03125, %v1507_v6 }
 0x675   : > { %v1510_v8 = vsub.f32 %v1504_v3, %v1509_v7 }
 0x677   : > { %v1511_v9 = vmul.f32 %v1510_v8, %v1510_v8 }
 0x679   : > { %v1512_v10 = vsel %vm864_vm2, %v1511_v9, 0.0 }
 0x67a   : > { %1513 = vadd.xlane.f32.xlu0 %v1512_v10 }
 0x707   : > { %v1514_v14 = vpop.xlane.xlu0 %1513 }
 0x708   : > { %v1515_v15 = vmul.f32 0.03125, %v1514_v14 }
 0x70a   : > { %v1516_v16 = vadd.f32 1e-05, %v1515_v15 }
 0x70c   : > { %2332 = vrsqrt.f32 %v1516_v16 }
 0x716   : > { %v2333_v17 = vpop.eup %2332 }
 0x717   : > { %v1518_v19 = vmul.f32 %v2333_v17, %v1510_v8 }
 0x719   : > { %v1526_v21 = vmul.f32 %v2030_v18, %v1518_v19 }
 0x71b   : > { %v1534_v22 = vadd.f32 %v2031_v20, %v1526_v21 }
 0x71d   : > { %v1535_v23 = vpack.c.bf16 %v1534_v22, %v1534_v22 }
 0x71f   : > { %2163 = vmatmul.mubr.msk.bf16.vlgmr.msra.gmra.mrb[24].mxu1 %vm864_vm2, %v1535_v23 }
 0x7f2   : > { %v1596_v27 = vpop.f32.mrb[24].mxu1 }
 0x7f3   : > { %v1597_v28 = vadd.f32 %v2032_v26, %v1596_v27  ;;  %v2164_v29 = vpop.f32.mrb[25].mxu1 }
 0x7f4   : > { %v1599_v30 = vpop.f32.mrb[26].mxu1 }
 0x7f5   : > { %v1602_v31 = vmax.f32 %v1597_v28, 0.0  ;;  %v2165_v32 = vpop.f32.mrb[27].mxu1 }
 0x7f7   : > { %v1603_v33 = vpack.c.bf16 %v1602_v31, %v1602_v31 }
 0x7f9   : > { %2175 = vmatmul.mubr.msk.bf16.vlgmr.msra.gmra.mrb[20].mxu0 %vm1643_vm8, %v1603_v33 }
 0x8cc   : > { %v1681_v34 = vpop.f32.mrb[20].mxu0 }
 0x8cd   : > { %v1682_v35 = vadd.f32 %v2036_v2, %v1681_v34  ;;  %v2176_v36 = vpop.f32.mrb[21].mxu0 }
 0x8ce   : > { %v1684_v37 = vpop.f32.mrb[22].mxu0 }
 0x8cf   : > { %v2177_v38 = vpop.f32.mrb[23].mxu0  ;;  %v1687_v39 = vadd.f32 %v1682_v35, %v1534_v22 }
 0x8d1   : > { %v1688_v40 = vsel %vm864_vm2, %v1687_v39, 0.0 }
 0x8d2   : > { %1689 = vadd.xlane.f32.xlu0 %v1688_v40 }
 0x95f   : > { %v1690_v41 = vpop.xlane.xlu0 %1689 }
 0x960   : > { %v1691_v42 = vmul.f32 0.03125, %v1690_v41 }
 0x962   : > { %v1692_v43 = vsub.f32 %v1687_v39, %v1691_v42 }
 0x964   : > { %v1693_v44 = vmul.f32 %v1692_v43, %v1692_v43 }
 0x966   : > { %v1694_v45 = vsel %vm864_vm2, %v1693_v44, 0.0 }
 0x967   : > { %1695 = vadd.xlane.f32.xlu1 %v1694_v45 }
 0x9f4   : > { %v1696_v46 = vpop.xlane.xlu1 %1695 }
 0x9f5   : > { %v1697_v47 = vmul.f32 0.03125, %v1696_v46 }
 0x9f7   : > { %v1698_v48 = vadd.f32 1e-05, %v1697_v47 }
 0x9f9   : > { %2334 = vrsqrt.f32 %v1698_v48 }
 0xa03   : > { %v2335_v49 = vpop.eup %2334 }
 0xa04   : > { %v1700_v51 = vmul.f32 %v2335_v49, %v1692_v43 }
 0xa06   : > { %v1708_v53 = vmul.f32 %v2042_v50, %v1700_v51 }
 0xa08   : > { %v1716_v54 = vadd.f32 %v2043_v52, %v1708_v53 }
 0xa0a   : > { %1717 = vst.msk [vmem:[%s3019_s23] sm:$0xff] %vm864_vm2, %v1716_v54 }
 0xa0b   : > { %2439 = shalt.err (!%p2436_p12)
}
 0xa0c   : > { %s2440_s20 = scalar_lea.hbm %s3181_s13, 128  ;;  %s2444_s10 = scalar_lea.hbm %s3366_s6, 256 }
 0xa0d   : > { %p2441_p0 = scmp.ne.s32.totalorder %s3181_s13, %s2440_s20  ;;  %p2445_p1 = scmp.lt.u32.totalorder %s3181_s13, %s3366_s6 }
 0xa0e   : > { %p2446_p10 = scmp.lt.u32.totalorder %s2444_s10, %s2440_s20  ;;  %p2448_p7 = scmp.lt.u32.totalorder %s2440_s20, %s3181_s13 }
 0xa0f   : > { %p2442_p2 = pnand %p2441_p0, %p3367_p13 }
 0xa10   : > { %p2447_p11 = por %p2446_p10, %p2445_p1 }
 0xa11   : > { %p2443_p8 = pneg %p2442_p2 }
 0xa12   : > { %p2449_p3 = por %p2448_p7, %p2447_p11 }
 0xa14   : > { %p2450_p9 = pnand %p2449_p3, %p2443_p8 }
 0xa16   : > { %2453 = shalt.err (!%p2450_p9)
}
 0xa17   : > { %2184 = dma.vmem_to_hbm [thread:$0]  (%p3367_p13), %s3183_s29, 128, %s3181_s13, %s1719_s26  }
 0xa18 PF: > { %s3368_s15 = sld [smem:[#allocation22_spill]]  ;;  %s3369_s30 = sld [smem:[#allocation16_spill]] }
 0xa19   : > { %s3370_s5 = sld [smem:[#allocation28_spill]] }
 0xa1e   : > { %p2201_p4 = scmp.ge.s32.totalorder %s3368_s15, 2  ;;  %s1744_s2 = sand.u32 1, %s3369_s30  }
 0xa1f   : > { %p3371_p6 = scmp.ne.s32.totalorder %s3370_s5, 0  ;;  %s1745_s9 = scalar_lea.sflag [#allocation5], %s1744_s2 }
 0xa21   : > { %p2197_p5 = pnand %p2201_p4, %p3371_p6 }
 0xa23   : > { %2511 = dma.done.wait (!%p2197_p5), %s1745_s9, 128  }
 0xa24   : > { %2513 = vsyncadd (!%p2197_p5), %s1745_s9, 4294967168  ;;  %s35_s0 = sadd.s32 1, %s3368_s15   ;;  %s3372_s21 = sld [smem:[#allocation14_spill]] }
 0xa25   : > { %p32_p12 = scmp.ge.s32.totalorder %s35_s0, 6   ;;  %s3373_s22 = sld [smem:[#allocation15_spill]] }
 0xa26   : > { %s3374_s23 = sld [smem:[#allocation25_spill]]  ;;  %s3375_s24 = sld [smem:[#allocation17_spill]] }
 0xa27   : > { %s3376_s25 = sld [smem:[#allocation18_spill]]  ;;  %s3377_s26 = sld [smem:[#allocation26_spill]] }
 0xa28   : > { %s3378_s27 = sld [smem:[#allocation20_spill]]  ;;  %s3379_s28 = sld [smem:[#allocation21_spill]] }
 0xa29   : > { %s3380_s29 = sld [smem:[#allocation23_spill]]  ;;  %s3381_s30 = sld [smem:[#allocation24_spill]] }
 0xa2a   :  { %34 = sbr.rel (!%p32_p12) target bundleno = 28 (0x1c), region = 196 }
 0xa31   :  { %1750 = vsyncpa [#allocation4], 1 }
 0xa32   :  { %1752 = vsyncpa [#allocation4 + $0x1], 1 }
 0xa33   :  { %1753 = vsyncpa [#allocation7], 1 }
 0xa34   :  { %1755 = vsyncpa [#allocation7 + $0x1], 1 }
 0xa35   :  { %1756 = vsyncpa [#allocation5], 1 }
 0xa36   :  { %1758 = vsyncpa [#allocation5 + $0x1], 1 }

</bundles_post_ra>
